<compile_context>
chip_gen: v7x
topology: tpu7x:2x2x1
jax: 0.10.0
libtpu: 0.0.40
codegen_flags: <defaults>
</compile_context>

<pallas_src>
import numpy as np
import jax
import jax.numpy as jnp
from jax.experimental import pallas as pl
from jax.experimental.pallas import tpu as pltpu

# ----------------------------- config ---------------------------------------
PAD_ID = 0

N_SRC_VOCAB = 16
LEN_MAX_SEQ = 8
D_WORD_VEC = 32
N_LAYERS = 2
N_HEADS = 2
D_K = 16
D_V = 16
D_MODEL = 32
D_INNER = 64

B = 2
S = 8

# packed-parameter layout constants
_QKV_W = N_HEADS * (D_K + D_K + D_V)          # 96  (Wq|Wk|Wv columns)
_WA_COLS = _QKV_W + D_MODEL + D_INNER         # 192 ([Wq|Wk|Wv | Wo | W1])
_BV_COLS = max(_QKV_W, D_INNER, D_MODEL)      # 96  (bias/LN slab width)


# --------------------------- sinusoid table ----------------------------------
def get_sinusoid_encoding_table(n_position, d_hid, padding_idx=None):
    def cal_angle(position, hid_idx):
        return position / np.power(10000, 2 * (hid_idx // 2) / d_hid)

    table = np.array(
        [[cal_angle(pos, j) for j in range(d_hid)] for pos in range(n_position)],
        dtype=np.float64,
    )
    table[:, 0::2] = np.sin(table[:, 0::2])
    table[:, 1::2] = np.cos(table[:, 1::2])
    if padding_idx is not None:
        table[padding_idx] = 0.0
    return jnp.asarray(table, dtype=jnp.float32)


# ----------------------------- shared math ------------------------------------
def _layer_norm(x, gamma, beta, eps=1e-5):
    mean = jnp.mean(x, axis=-1, keepdims=True)
    var = jnp.mean((x - mean) ** 2, axis=-1, keepdims=True)
    return (x - mean) * jax.lax.rsqrt(var + eps) * gamma + beta


# ----------------------------- kernel ----------------------------------------
def encoder_kernel(x_ref, mask_ref, npm_ref, wa_ref, w2_ref, bv_ref, out_ref):
    x = x_ref[...]            # (B*S, D_MODEL) f32
    add_mask = mask_ref[...]  # (B*S, B*S) f32 additive mask (-1e9 masked / 0)
    npm = npm_ref[...]        # (B*S, 1)  f32 non-pad mask

    inv_temp = 1.0 / float(np.sqrt(D_K))
    nq = N_HEADS * D_K        # 32

    for l in range(N_LAYERS):          # static unroll: both layers fused,
        wa = wa_ref[l]                 # activation stays in VMEM/vregs.
        w2 = w2_ref[l]                 # (D_INNER, D_MODEL)
        bvec = bv_ref[l]               # (8, _BV_COLS)

        wqkv = wa[:, 0:_QKV_W]                         # (32, 96)
        wo = wa[:, _QKV_W:_QKV_W + D_MODEL]            # (32, 32)
        w1 = wa[:, _QKV_W + D_MODEL:_WA_COLS]          # (32, 64)

        bqkv = bvec[0:1, :]                            # (1, 96)
        bo = bvec[1:2, 0:D_MODEL]
        g1 = bvec[2:3, 0:D_MODEL]
        be1 = bvec[3:4, 0:D_MODEL]
        b1 = bvec[4:5, 0:D_INNER]
        b2 = bvec[5:6, 0:D_MODEL]
        g2 = bvec[6:7, 0:D_MODEL]
        be2 = bvec[7:8, 0:D_MODEL]

        residual = x

        # Fused QKV projection: one MXU push with a 96-lane output.
        qkv = jnp.dot(x, wqkv, preferred_element_type=jnp.float32) + bqkv
        q = qkv[:, 0:nq]
        k = qkv[:, nq:2 * nq]
        v = qkv[:, 2 * nq:3 * nq]

        # Multi-head attention over the flattened (B*S) rows; cross-batch and
        # padded/subsequent keys are removed by the additive block-diag mask.
        heads = []
        for h in range(N_HEADS):
            qh = q[:, h * D_K:(h + 1) * D_K]
            kh = k[:, h * D_K:(h + 1) * D_K]
            vh = v[:, h * D_V:(h + 1) * D_V]

            scores = (jnp.dot(qh, kh.T, preferred_element_type=jnp.float32)
                      * inv_temp + add_mask)
            scores = scores - jnp.max(scores, axis=-1, keepdims=True)
            p = jnp.exp(scores)
            p = p / jnp.sum(p, axis=-1, keepdims=True)
            heads.append(jnp.dot(p, vh, preferred_element_type=jnp.float32))

        # Concat heads, single output projection (== torch concat -> fc).
        attn = jnp.dot(jnp.concatenate(heads, axis=-1), wo,
                       preferred_element_type=jnp.float32) + bo
        x1 = _layer_norm(attn + residual, g1, be1) * npm

        # Position-wise FFN (Conv1d kernel-size-1 == matmul).
        h1 = jnp.maximum(
            jnp.dot(x1, w1, preferred_element_type=jnp.float32) + b1, 0.0)
        h2 = jnp.dot(h1, w2, preferred_element_type=jnp.float32) + b2
        x = _layer_norm(h2 + x1, g2, be2) * npm

    # TODO(synk): output last dim is 32 (<128 lanes) -> masked store; a
    # lane-dense (B, S*D) writeback would need an in-kernel cross-lane
    # relayout that costs more than it saves at this toy size.
    out_ref[...] = x.astype(out_ref.dtype)


def encoder_layers_fused(x_flat, add_mask, npm, wa, wb, bvec):
    BSn, Dd = x_flat.shape
    return pl.pallas_call(
        encoder_kernel,
        out_shape=jax.ShapeDtypeStruct((BSn, Dd), jnp.float32),
        grid_spec=pltpu.PrefetchScalarGridSpec(
            num_scalar_prefetch=0,
            grid=(1,),                       # whole problem in one step
            in_specs=[
                pl.BlockSpec((BSn, Dd), lambda i: (0, 0)),
                pl.BlockSpec(add_mask.shape, lambda i: (0, 0)),
                pl.BlockSpec(npm.shape, lambda i: (0, 0)),
                pl.BlockSpec(wa.shape, lambda i: (0, 0, 0)),
                pl.BlockSpec(wb.shape, lambda i: (0, 0, 0)),
                pl.BlockSpec(bvec.shape, lambda i: (0, 0, 0)),
            ],
            out_specs=pl.BlockSpec((BSn, Dd), lambda i: (0, 0)),
        ),
    )(x_flat, add_mask, npm, wa, wb, bvec)


# --------------------------- masks (XLA glue) ---------------------------------
def build_masks(src_seq):
    """Per-batch masks (used by the pure-JAX reference)."""
    Bb, Ss = src_seq.shape
    subseq = jnp.triu(jnp.ones((Ss, Ss), jnp.float32), k=1)[None, :, :]      # (1,S,S)
    keypad = (src_seq == PAD_ID).astype(jnp.float32)[:, None, :]             # (B,1,S)
    slf_attn_mask = ((keypad + subseq) > 0).astype(jnp.float32)              # (B,S,S)
    non_pad_mask = (src_seq != PAD_ID).astype(jnp.float32)[:, :, None]       # (B,S,1)
    return slf_attn_mask, non_pad_mask


def build_flat_masks(src_seq):
    """Additive block-diagonal mask over flattened (B*S) rows for the kernel."""
    Bb, Ss = src_seq.shape
    subseq = jnp.triu(jnp.ones((Ss, Ss), jnp.float32), k=1)[None, :, :]
    keypad = (src_seq == PAD_ID).astype(jnp.float32)[:, None, :]
    m = ((keypad + subseq) > 0).astype(jnp.float32)                          # (B,S,S)
    eye = jnp.eye(Bb, dtype=jnp.float32)                                     # (B,B)
    # big[b,i,b2,j] = m[b,i,j] if b==b2 else 1 (cross-batch fully masked)
    big = (eye[:, None, :, None] * m[:, :, None, :]
           + (1.0 - eye)[:, None, :, None])
    add_mask = (-1e9) * big.reshape(Bb * Ss, Bb * Ss)                        # (BS,BS)
    npm = (src_seq != PAD_ID).astype(jnp.float32).reshape(Bb * Ss, 1)        # (BS,1)
    return add_mask, npm


# --------------------------- param packing ------------------------------------
def pack_layer_params(layer_params_list):
    """Pack 16 per-layer tensors into 3 stacked arrays (fewer, larger DMAs)."""
    wa_list, wb_list, bv_list = [], [], []

    def row(v, width=_BV_COLS):
        v = v.reshape(1, -1)
        return jnp.pad(v, ((0, 0), (0, width - v.shape[1])))

    for lp in layer_params_list:
        (wq, bq, wk, bk, wv, bvv, wo, bo,
         g1, be1, w1, b1, w2, b2, g2, be2) = lp
        wa_list.append(jnp.concatenate([wq, wk, wv, wo, w1], axis=1))   # (32,192)
        wb_list.append(w2)                                              # (64,32)
        bv_list.append(jnp.concatenate([
            row(jnp.concatenate([bq, bk, bvv], axis=1)),   # row 0: bqkv (96)
            row(bo), row(g1), row(be1),
            row(b1), row(b2), row(g2), row(be2)], axis=0))              # (8,96)
    return (jnp.stack(wa_list), jnp.stack(wb_list), jnp.stack(bv_list))


# --------------------------- full encoder -------------------------------------
def encoder_forward(src_seq, src_pos, emb, pos_table, packed_params):
    add_mask, npm = build_flat_masks(src_seq)
    x = emb[src_seq] + pos_table[src_pos]                 # (B,S,D)
    Bb, Ss, Dd = x.shape
    wa, wb, bvec = packed_params
    y = encoder_layers_fused(x.reshape(Bb * Ss, Dd), add_mask, npm, wa, wb, bvec)
    return y.reshape(Bb, Ss, Dd)


encoder_forward_jit = jax.jit(encoder_forward)


# --------------------------- pure-JAX reference -------------------------------
def encoder_layer_ref(x, mask, npm, lp):
    (wq, bq, wk, bk, wv, bv, wo, bo, g1, be1, w1, bf1, w2, bf2, g2, be2) = lp
    res = x
    q = x @ wq + bq
    k = x @ wk + bk
    v = x @ wv + bv
    heads = []
    for h in range(N_HEADS):
        qh = q[..., h * D_K:(h + 1) * D_K]
        kh = k[..., h * D_K:(h + 1) * D_K]
        vh = v[..., h * D_V:(h + 1) * D_V]
        s = jnp.einsum("bqd,bkd->bqk", qh, kh) / np.sqrt(D_K)
        s = jnp.where(mask > 0, -1e9, s)
        p = jax.nn.softmax(s, axis=-1)
        heads.append(jnp.einsum("bqk,bkd->bqd", p, vh))
    a = jnp.concatenate(heads, axis=-1) @ wo + bo
    x1 = _layer_norm(a + res, g1, be1) * npm
    h1 = jax.nn.relu(x1 @ w1 + bf1)
    x2 = _layer_norm(h1 @ w2 + bf2 + x1, g2, be2) * npm
    return x2


def encoder_forward_ref(src_seq, src_pos, emb, pos_table, layer_params_list):
    mask, npm = build_masks(src_seq)
    x = emb[src_seq] + pos_table[src_pos]
    for lp in layer_params_list:
        x = encoder_layer_ref(x, mask, npm, lp)
    return x


# ------------------------------ params ----------------------------------------
def init_params(key):
    kemb, klayers = jax.random.split(key)
    emb = 0.1 * jax.random.normal(kemb, (N_SRC_VOCAB, D_WORD_VEC), jnp.float32)
    emb = emb.at[PAD_ID].set(0.0)  # padding_idx=pad_id
    pos_table = get_sinusoid_encoding_table(LEN_MAX_SEQ + 1, D_WORD_VEC, padding_idx=0)

    layer_params = []
    lkeys = jax.random.split(klayers, N_LAYERS)
    sq = float(np.sqrt(2.0 / (D_MODEL + D_K)))
    sv = float(np.sqrt(2.0 / (D_MODEL + D_V)))
    for l in range(N_LAYERS):
        k = jax.random.split(lkeys[l], 6)
        wq = sq * jax.random.normal(k[0], (D_MODEL, N_HEADS * D_K), jnp.float32)
        wk = sq * jax.random.normal(k[1], (D_MODEL, N_HEADS * D_K), jnp.float32)
        wv = sv * jax.random.normal(k[2], (D_MODEL, N_HEADS * D_V), jnp.float32)
        wo = 0.1 * jax.random.normal(k[3], (N_HEADS * D_V, D_MODEL), jnp.float32)
        w1 = 0.1 * jax.random.normal(k[4], (D_MODEL, D_INNER), jnp.float32)
        w2 = 0.1 * jax.random.normal(k[5], (D_INNER, D_MODEL), jnp.float32)
        zeros_d = jnp.zeros((1, D_MODEL), jnp.float32)
        ones_d = jnp.ones((1, D_MODEL), jnp.float32)
        lp = (
            wq, jnp.zeros((1, N_HEADS * D_K), jnp.float32),
            wk, jnp.zeros((1, N_HEADS * D_K), jnp.float32),
            wv, jnp.zeros((1, N_HEADS * D_V), jnp.float32),
            wo, zeros_d,
            ones_d, zeros_d,                       # LayerNorm 1
            w1, jnp.zeros((1, D_INNER), jnp.float32),
            w2, zeros_d,
            ones_d, zeros_d,                       # LayerNorm 2
        )
        layer_params.append(lp)
    return emb, pos_table, layer_params


# ------------------------------- main ------------------------------------------
if __name__ == "__main__":
    key = jax.random.PRNGKey(0)
    kseq, kparams = jax.random.split(key)

    src_seq = jax.random.randint(kseq, (B, S), 1, N_SRC_VOCAB).astype(jnp.int32)
    src_seq = src_seq.at[1, 6:].set(PAD_ID)  # exercise pad masking
    src_pos = jnp.where(
        src_seq != PAD_ID, jnp.arange(1, S + 1, dtype=jnp.int32)[None, :], 0
    ).astype(jnp.int32)

    emb, pos_table, layer_params = init_params(kparams)
    packed = pack_layer_params(layer_params)

    out = encoder_forward_jit(src_seq, src_pos, emb, pos_table, packed)
    out = jax.block_until_ready(out)

    ref = encoder_forward_ref(src_seq, src_pos, emb, pos_table, layer_params)
    ref = jax.block_until_ready(ref)

    assert out.shape == (B, S, D_MODEL)
    assert np.allclose(np.asarray(out), np.asarray(ref), atol=1e-4, rtol=1e-4)

    print("KERNEL_OK")
</pallas_src>

<mosaic_0001>
module attributes {stable_mosaic.version = 11 : i64} {
  func.func @encoder_kernel(%arg0: i32, %arg1: memref<16x32xf32, #tpu.memory_space<vmem>>, %arg2: memref<16x16xf32, #tpu.memory_space<vmem>>, %arg3: memref<16x1xf32, #tpu.memory_space<vmem>>, %arg4: memref<2x32x192xf32, #tpu.memory_space<vmem>>, %arg5: memref<2x64x32xf32, #tpu.memory_space<vmem>>, %arg6: memref<2x8x96xf32, #tpu.memory_space<vmem>>, %arg7: memref<16x32xf32, #tpu.memory_space<vmem>>) attributes {dimension_semantics = [#tpu.dimension_semantics<arbitrary>], iteration_bounds = array<i64: 1>, scalar_prefetch = 0 : i64, scratch_operands = 0 : i64, tpu.core_type = #tpu.core_type<tc>, window_params = [{pipeline_mode = #tpu.pipeline_mode<synchronous>, transform_indices = @transform_0, window_bounds = array<i64: 16, 32>}, {pipeline_mode = #tpu.pipeline_mode<synchronous>, transform_indices = @transform_1, window_bounds = array<i64: 16, 16>}, {pipeline_mode = #tpu.pipeline_mode<synchronous>, transform_indices = @transform_2, window_bounds = array<i64: 16, 1>}, {pipeline_mode = #tpu.pipeline_mode<synchronous>, transform_indices = @transform_3, window_bounds = array<i64: 2, 32, 192>}, {pipeline_mode = #tpu.pipeline_mode<synchronous>, transform_indices = @transform_4, window_bounds = array<i64: 2, 64, 32>}, {pipeline_mode = #tpu.pipeline_mode<synchronous>, transform_indices = @transform_5, window_bounds = array<i64: 2, 8, 96>}, {pipeline_mode = #tpu.pipeline_mode<synchronous>, transform_indices = @transform_6, window_bounds = array<i64: 16, 32>}]} {
    %c0 = arith.constant 0 : index
    %c0_0 = arith.constant 0 : index
    %0 = vector.load %arg1[%c0, %c0_0] : memref<16x32xf32, #tpu.memory_space<vmem>>, vector<16x32xf32>
    %c0_1 = arith.constant 0 : index
    %c0_2 = arith.constant 0 : index
    %1 = vector.load %arg2[%c0_1, %c0_2] : memref<16x16xf32, #tpu.memory_space<vmem>>, vector<16x16xf32>
    %c0_3 = arith.constant 0 : index
    %c0_4 = arith.constant 0 : index
    %2 = vector.load %arg3[%c0_3, %c0_4] : memref<16x1xf32, #tpu.memory_space<vmem>>, vector<16x1xf32>
    %c0_5 = arith.constant 0 : index
    %c0_6 = arith.constant 0 : index
    %c0_7 = arith.constant 0 : index
    %3 = vector.load %arg4[%c0_5, %c0_6, %c0_7] : memref<2x32x192xf32, #tpu.memory_space<vmem>>, vector<1x32x192xf32>
    %4 = vector.shape_cast %3 : vector<1x32x192xf32> to vector<32x192xf32>
    %c0_8 = arith.constant 0 : index
    %c0_9 = arith.constant 0 : index
    %c0_10 = arith.constant 0 : index
    %5 = vector.load %arg5[%c0_8, %c0_9, %c0_10] : memref<2x64x32xf32, #tpu.memory_space<vmem>>, vector<1x64x32xf32>
    %6 = vector.shape_cast %5 : vector<1x64x32xf32> to vector<64x32xf32>
    %c0_11 = arith.constant 0 : index
    %c0_12 = arith.constant 0 : index
    %c0_13 = arith.constant 0 : index
    %7 = vector.load %arg6[%c0_11, %c0_12, %c0_13] : memref<2x8x96xf32, #tpu.memory_space<vmem>>, vector<1x8x96xf32>
    %8 = vector.shape_cast %7 : vector<1x8x96xf32> to vector<8x96xf32>
    %9 = vector.extract_strided_slice %4 {offsets = [0, 0], sizes = [32, 96], strides = [1, 1]} : vector<32x192xf32> to vector<32x96xf32>
    %10 = vector.extract_strided_slice %4 {offsets = [0, 96], sizes = [32, 32], strides = [1, 1]} : vector<32x192xf32> to vector<32x32xf32>
    %11 = vector.extract_strided_slice %4 {offsets = [0, 128], sizes = [32, 64], strides = [1, 1]} : vector<32x192xf32> to vector<32x64xf32>
    %12 = vector.extract_strided_slice %8 {offsets = [0, 0], sizes = [1, 96], strides = [1, 1]} : vector<8x96xf32> to vector<1x96xf32>
    %13 = vector.extract_strided_slice %8 {offsets = [1, 0], sizes = [1, 32], strides = [1, 1]} : vector<8x96xf32> to vector<1x32xf32>
    %14 = vector.extract_strided_slice %8 {offsets = [2, 0], sizes = [1, 32], strides = [1, 1]} : vector<8x96xf32> to vector<1x32xf32>
    %15 = vector.extract_strided_slice %8 {offsets = [3, 0], sizes = [1, 32], strides = [1, 1]} : vector<8x96xf32> to vector<1x32xf32>
    %16 = vector.extract_strided_slice %8 {offsets = [4, 0], sizes = [1, 64], strides = [1, 1]} : vector<8x96xf32> to vector<1x64xf32>
    %17 = vector.extract_strided_slice %8 {offsets = [5, 0], sizes = [1, 32], strides = [1, 1]} : vector<8x96xf32> to vector<1x32xf32>
    %18 = vector.extract_strided_slice %8 {offsets = [6, 0], sizes = [1, 32], strides = [1, 1]} : vector<8x96xf32> to vector<1x32xf32>
    %19 = vector.extract_strided_slice %8 {offsets = [7, 0], sizes = [1, 32], strides = [1, 1]} : vector<8x96xf32> to vector<1x32xf32>
    %cst = arith.constant dense<0.000000e+00> : vector<16x96xf32>
    %20 = tpu.matmul %0, %9, %cst {dimension_numbers = #tpu.dot_dimension_numbers<[1], [0], [0], [1], [0, 0, 1, 1], [], []>} : vector<16x32xf32>, vector<32x96xf32>, vector<16x96xf32> -> vector<16x96xf32>
    %21 = vector.broadcast %12 : vector<1x96xf32> to vector<16x96xf32>
    %22 = arith.addf %20, %21 : vector<16x96xf32>
    %23 = vector.extract_strided_slice %22 {offsets = [0, 0], sizes = [16, 32], strides = [1, 1]} : vector<16x96xf32> to vector<16x32xf32>
    %24 = vector.extract_strided_slice %22 {offsets = [0, 32], sizes = [16, 32], strides = [1, 1]} : vector<16x96xf32> to vector<16x32xf32>
    %25 = vector.extract_strided_slice %22 {offsets = [0, 64], sizes = [16, 32], strides = [1, 1]} : vector<16x96xf32> to vector<16x32xf32>
    %26 = vector.extract_strided_slice %23 {offsets = [0, 0], sizes = [16, 16], strides = [1, 1]} : vector<16x32xf32> to vector<16x16xf32>
    %27 = vector.extract_strided_slice %24 {offsets = [0, 0], sizes = [16, 16], strides = [1, 1]} : vector<16x32xf32> to vector<16x16xf32>
    %28 = vector.extract_strided_slice %25 {offsets = [0, 0], sizes = [16, 16], strides = [1, 1]} : vector<16x32xf32> to vector<16x16xf32>
    %29 = tpu.transpose %27, [1, 0] : vector<16x16xf32> -> vector<16x16xf32>
    %cst_14 = arith.constant dense<0.000000e+00> : vector<16x16xf32>
    %30 = tpu.matmul %26, %29, %cst_14 {dimension_numbers = #tpu.dot_dimension_numbers<[1], [0], [0], [1], [0, 0, 1, 1], [], []>} : vector<16x16xf32>, vector<16x16xf32>, vector<16x16xf32> -> vector<16x16xf32>
    %cst_15 = arith.constant 2.500000e-01 : f32
    %31 = vector.broadcast %cst_15 : f32 to vector<16x16xf32>
    %32 = arith.mulf %30, %31 : vector<16x16xf32>
    %33 = arith.addf %32, %1 : vector<16x16xf32>
    %cst_16 = arith.constant dense<0xFF800000> : vector<16xf32>
    %34 = vector.multi_reduction <maximumf>, %33, %cst_16 [1] : vector<16x16xf32> to vector<16xf32>
    %35 = vector.shape_cast %34 : vector<16xf32> to vector<16x1xf32>
    %36 = vector.broadcast %35 : vector<16x1xf32> to vector<16x16xf32>
    %37 = arith.subf %33, %36 : vector<16x16xf32>
    %38 = math.exp %37 : vector<16x16xf32>
    %cst_17 = arith.constant dense<0.000000e+00> : vector<16xf32>
    %39 = vector.multi_reduction <add>, %38, %cst_17 [1] : vector<16x16xf32> to vector<16xf32>
    %40 = vector.shape_cast %39 : vector<16xf32> to vector<16x1xf32>
    %41 = vector.broadcast %40 : vector<16x1xf32> to vector<16x16xf32>
    %42 = arith.divf %38, %41 : vector<16x16xf32>
    %cst_18 = arith.constant dense<0.000000e+00> : vector<16x16xf32>
    %43 = tpu.matmul %42, %28, %cst_18 {dimension_numbers = #tpu.dot_dimension_numbers<[1], [0], [0], [1], [0, 0, 1, 1], [], []>} : vector<16x16xf32>, vector<16x16xf32>, vector<16x16xf32> -> vector<16x16xf32>
    %44 = vector.extract_strided_slice %23 {offsets = [0, 16], sizes = [16, 16], strides = [1, 1]} : vector<16x32xf32> to vector<16x16xf32>
    %45 = vector.extract_strided_slice %24 {offsets = [0, 16], sizes = [16, 16], strides = [1, 1]} : vector<16x32xf32> to vector<16x16xf32>
    %46 = vector.extract_strided_slice %25 {offsets = [0, 16], sizes = [16, 16], strides = [1, 1]} : vector<16x32xf32> to vector<16x16xf32>
    %47 = tpu.transpose %45, [1, 0] : vector<16x16xf32> -> vector<16x16xf32>
    %cst_19 = arith.constant dense<0.000000e+00> : vector<16x16xf32>
    %48 = tpu.matmul %44, %47, %cst_19 {dimension_numbers = #tpu.dot_dimension_numbers<[1], [0], [0], [1], [0, 0, 1, 1], [], []>} : vector<16x16xf32>, vector<16x16xf32>, vector<16x16xf32> -> vector<16x16xf32>
    %cst_20 = arith.constant 2.500000e-01 : f32
    %49 = vector.broadcast %cst_20 : f32 to vector<16x16xf32>
    %50 = arith.mulf %48, %49 : vector<16x16xf32>
    %51 = arith.addf %50, %1 : vector<16x16xf32>
    %cst_21 = arith.constant dense<0xFF800000> : vector<16xf32>
    %52 = vector.multi_reduction <maximumf>, %51, %cst_21 [1] : vector<16x16xf32> to vector<16xf32>
    %53 = vector.shape_cast %52 : vector<16xf32> to vector<16x1xf32>
    %54 = vector.broadcast %53 : vector<16x1xf32> to vector<16x16xf32>
    %55 = arith.subf %51, %54 : vector<16x16xf32>
    %56 = math.exp %55 : vector<16x16xf32>
    %cst_22 = arith.constant dense<0.000000e+00> : vector<16xf32>
    %57 = vector.multi_reduction <add>, %56, %cst_22 [1] : vector<16x16xf32> to vector<16xf32>
    %58 = vector.shape_cast %57 : vector<16xf32> to vector<16x1xf32>
    %59 = vector.broadcast %58 : vector<16x1xf32> to vector<16x16xf32>
    %60 = arith.divf %56, %59 : vector<16x16xf32>
    %cst_23 = arith.constant dense<0.000000e+00> : vector<16x16xf32>
    %61 = tpu.matmul %60, %46, %cst_23 {dimension_numbers = #tpu.dot_dimension_numbers<[1], [0], [0], [1], [0, 0, 1, 1], [], []>} : vector<16x16xf32>, vector<16x16xf32>, vector<16x16xf32> -> vector<16x16xf32>
    %62 = tpu.concatenate %43, %61 in 1 : vector<16x16xf32>, vector<16x16xf32> -> vector<16x32xf32>
    %cst_24 = arith.constant dense<0.000000e+00> : vector<16x32xf32>
    %63 = tpu.matmul %62, %10, %cst_24 {dimension_numbers = #tpu.dot_dimension_numbers<[1], [0], [0], [1], [0, 0, 1, 1], [], []>} : vector<16x32xf32>, vector<32x32xf32>, vector<16x32xf32> -> vector<16x32xf32>
    %64 = vector.broadcast %13 : vector<1x32xf32> to vector<16x32xf32>
    %65 = arith.addf %63, %64 : vector<16x32xf32>
    %66 = arith.addf %65, %0 : vector<16x32xf32>
    %cst_25 = arith.constant dense<0.000000e+00> : vector<16xf32>
    %67 = vector.multi_reduction <add>, %66, %cst_25 [1] : vector<16x32xf32> to vector<16xf32>
    %68 = vector.shape_cast %67 : vector<16xf32> to vector<16x1xf32>
    %cst_26 = arith.constant 3.200000e+01 : f32
    %69 = vector.broadcast %cst_26 : f32 to vector<16x1xf32>
    %70 = arith.divf %68, %69 : vector<16x1xf32>
    %71 = vector.broadcast %70 : vector<16x1xf32> to vector<16x32xf32>
    %72 = arith.subf %66, %71 : vector<16x32xf32>
    %73 = arith.mulf %72, %72 : vector<16x32xf32>
    %cst_27 = arith.constant dense<0.000000e+00> : vector<16xf32>
    %74 = vector.multi_reduction <add>, %73, %cst_27 [1] : vector<16x32xf32> to vector<16xf32>
    %75 = vector.shape_cast %74 : vector<16xf32> to vector<16x1xf32>
    %cst_28 = arith.constant 3.200000e+01 : f32
    %76 = vector.broadcast %cst_28 : f32 to vector<16x1xf32>
    %77 = arith.divf %75, %76 : vector<16x1xf32>
    %78 = vector.broadcast %70 : vector<16x1xf32> to vector<16x32xf32>
    %79 = arith.subf %66, %78 : vector<16x32xf32>
    %cst_29 = arith.constant 9.99999974E-6 : f32
    %80 = vector.broadcast %cst_29 : f32 to vector<16x1xf32>
    %81 = arith.addf %77, %80 : vector<16x1xf32>
    %82 = math.rsqrt %81 : vector<16x1xf32>
    %83 = vector.broadcast %82 : vector<16x1xf32> to vector<16x32xf32>
    %84 = arith.mulf %79, %83 : vector<16x32xf32>
    %85 = vector.broadcast %14 : vector<1x32xf32> to vector<16x32xf32>
    %86 = arith.mulf %84, %85 : vector<16x32xf32>
    %87 = vector.broadcast %15 : vector<1x32xf32> to vector<16x32xf32>
    %88 = arith.addf %86, %87 : vector<16x32xf32>
    %89 = vector.broadcast %2 : vector<16x1xf32> to vector<16x32xf32>
    %90 = arith.mulf %88, %89 : vector<16x32xf32>
    %cst_30 = arith.constant dense<0.000000e+00> : vector<16x64xf32>
    %91 = tpu.matmul %90, %11, %cst_30 {dimension_numbers = #tpu.dot_dimension_numbers<[1], [0], [0], [1], [0, 0, 1, 1], [], []>} : vector<16x32xf32>, vector<32x64xf32>, vector<16x64xf32> -> vector<16x64xf32>
    %92 = vector.broadcast %16 : vector<1x64xf32> to vector<16x64xf32>
    %93 = arith.addf %91, %92 : vector<16x64xf32>
    %cst_31 = arith.constant 0.000000e+00 : f32
    %94 = vector.broadcast %cst_31 : f32 to vector<16x64xf32>
    %95 = arith.maximumf %93, %94 : vector<16x64xf32>
    %cst_32 = arith.constant dense<0.000000e+00> : vector<16x32xf32>
    %96 = tpu.matmul %95, %6, %cst_32 {dimension_numbers = #tpu.dot_dimension_numbers<[1], [0], [0], [1], [0, 0, 1, 1], [], []>} : vector<16x64xf32>, vector<64x32xf32>, vector<16x32xf32> -> vector<16x32xf32>
    %97 = vector.broadcast %17 : vector<1x32xf32> to vector<16x32xf32>
    %98 = arith.addf %96, %97 : vector<16x32xf32>
    %99 = arith.addf %98, %90 : vector<16x32xf32>
    %cst_33 = arith.constant dense<0.000000e+00> : vector<16xf32>
    %100 = vector.multi_reduction <add>, %99, %cst_33 [1] : vector<16x32xf32> to vector<16xf32>
    %101 = vector.shape_cast %100 : vector<16xf32> to vector<16x1xf32>
    %cst_34 = arith.constant 3.200000e+01 : f32
    %102 = vector.broadcast %cst_34 : f32 to vector<16x1xf32>
    %103 = arith.divf %101, %102 : vector<16x1xf32>
    %104 = vector.broadcast %103 : vector<16x1xf32> to vector<16x32xf32>
    %105 = arith.subf %99, %104 : vector<16x32xf32>
    %106 = arith.mulf %105, %105 : vector<16x32xf32>
    %cst_35 = arith.constant dense<0.000000e+00> : vector<16xf32>
    %107 = vector.multi_reduction <add>, %106, %cst_35 [1] : vector<16x32xf32> to vector<16xf32>
    %108 = vector.shape_cast %107 : vector<16xf32> to vector<16x1xf32>
    %cst_36 = arith.constant 3.200000e+01 : f32
    %109 = vector.broadcast %cst_36 : f32 to vector<16x1xf32>
    %110 = arith.divf %108, %109 : vector<16x1xf32>
    %111 = vector.broadcast %103 : vector<16x1xf32> to vector<16x32xf32>
    %112 = arith.subf %99, %111 : vector<16x32xf32>
    %cst_37 = arith.constant 9.99999974E-6 : f32
    %113 = vector.broadcast %cst_37 : f32 to vector<16x1xf32>
    %114 = arith.addf %110, %113 : vector<16x1xf32>
    %115 = math.rsqrt %114 : vector<16x1xf32>
    %116 = vector.broadcast %115 : vector<16x1xf32> to vector<16x32xf32>
    %117 = arith.mulf %112, %116 : vector<16x32xf32>
    %118 = vector.broadcast %18 : vector<1x32xf32> to vector<16x32xf32>
    %119 = arith.mulf %117, %118 : vector<16x32xf32>
    %120 = vector.broadcast %19 : vector<1x32xf32> to vector<16x32xf32>
    %121 = arith.addf %119, %120 : vector<16x32xf32>
    %122 = vector.broadcast %2 : vector<16x1xf32> to vector<16x32xf32>
    %123 = arith.mulf %121, %122 : vector<16x32xf32>
    %c1 = arith.constant 1 : index
    %c0_38 = arith.constant 0 : index
    %c0_39 = arith.constant 0 : index
    %124 = vector.load %arg4[%c1, %c0_38, %c0_39] : memref<2x32x192xf32, #tpu.memory_space<vmem>>, vector<1x32x192xf32>
    %125 = vector.shape_cast %124 : vector<1x32x192xf32> to vector<32x192xf32>
    %c1_40 = arith.constant 1 : index
    %c0_41 = arith.constant 0 : index
    %c0_42 = arith.constant 0 : index
    %126 = vector.load %arg5[%c1_40, %c0_41, %c0_42] : memref<2x64x32xf32, #tpu.memory_space<vmem>>, vector<1x64x32xf32>
    %127 = vector.shape_cast %126 : vector<1x64x32xf32> to vector<64x32xf32>
    %c1_43 = arith.constant 1 : index
    %c0_44 = arith.constant 0 : index
    %c0_45 = arith.constant 0 : index
    %128 = vector.load %arg6[%c1_43, %c0_44, %c0_45] : memref<2x8x96xf32, #tpu.memory_space<vmem>>, vector<1x8x96xf32>
    %129 = vector.shape_cast %128 : vector<1x8x96xf32> to vector<8x96xf32>
    %130 = vector.extract_strided_slice %125 {offsets = [0, 0], sizes = [32, 96], strides = [1, 1]} : vector<32x192xf32> to vector<32x96xf32>
    %131 = vector.extract_strided_slice %125 {offsets = [0, 96], sizes = [32, 32], strides = [1, 1]} : vector<32x192xf32> to vector<32x32xf32>
    %132 = vector.extract_strided_slice %125 {offsets = [0, 128], sizes = [32, 64], strides = [1, 1]} : vector<32x192xf32> to vector<32x64xf32>
    %133 = vector.extract_strided_slice %129 {offsets = [0, 0], sizes = [1, 96], strides = [1, 1]} : vector<8x96xf32> to vector<1x96xf32>
    %134 = vector.extract_strided_slice %129 {offsets = [1, 0], sizes = [1, 32], strides = [1, 1]} : vector<8x96xf32> to vector<1x32xf32>
    %135 = vector.extract_strided_slice %129 {offsets = [2, 0], sizes = [1, 32], strides = [1, 1]} : vector<8x96xf32> to vector<1x32xf32>
    %136 = vector.extract_strided_slice %129 {offsets = [3, 0], sizes = [1, 32], strides = [1, 1]} : vector<8x96xf32> to vector<1x32xf32>
    %137 = vector.extract_strided_slice %129 {offsets = [4, 0], sizes = [1, 64], strides = [1, 1]} : vector<8x96xf32> to vector<1x64xf32>
    %138 = vector.extract_strided_slice %129 {offsets = [5, 0], sizes = [1, 32], strides = [1, 1]} : vector<8x96xf32> to vector<1x32xf32>
    %139 = vector.extract_strided_slice %129 {offsets = [6, 0], sizes = [1, 32], strides = [1, 1]} : vector<8x96xf32> to vector<1x32xf32>
    %140 = vector.extract_strided_slice %129 {offsets = [7, 0], sizes = [1, 32], strides = [1, 1]} : vector<8x96xf32> to vector<1x32xf32>
    %cst_46 = arith.constant dense<0.000000e+00> : vector<16x96xf32>
    %141 = tpu.matmul %123, %130, %cst_46 {dimension_numbers = #tpu.dot_dimension_numbers<[1], [0], [0], [1], [0, 0, 1, 1], [], []>} : vector<16x32xf32>, vector<32x96xf32>, vector<16x96xf32> -> vector<16x96xf32>
    %142 = vector.broadcast %133 : vector<1x96xf32> to vector<16x96xf32>
    %143 = arith.addf %141, %142 : vector<16x96xf32>
    %144 = vector.extract_strided_slice %143 {offsets = [0, 0], sizes = [16, 32], strides = [1, 1]} : vector<16x96xf32> to vector<16x32xf32>
    %145 = vector.extract_strided_slice %143 {offsets = [0, 32], sizes = [16, 32], strides = [1, 1]} : vector<16x96xf32> to vector<16x32xf32>
    %146 = vector.extract_strided_slice %143 {offsets = [0, 64], sizes = [16, 32], strides = [1, 1]} : vector<16x96xf32> to vector<16x32xf32>
    %147 = vector.extract_strided_slice %144 {offsets = [0, 0], sizes = [16, 16], strides = [1, 1]} : vector<16x32xf32> to vector<16x16xf32>
    %148 = vector.extract_strided_slice %145 {offsets = [0, 0], sizes = [16, 16], strides = [1, 1]} : vector<16x32xf32> to vector<16x16xf32>
    %149 = vector.extract_strided_slice %146 {offsets = [0, 0], sizes = [16, 16], strides = [1, 1]} : vector<16x32xf32> to vector<16x16xf32>
    %150 = tpu.transpose %148, [1, 0] : vector<16x16xf32> -> vector<16x16xf32>
    %cst_47 = arith.constant dense<0.000000e+00> : vector<16x16xf32>
    %151 = tpu.matmul %147, %150, %cst_47 {dimension_numbers = #tpu.dot_dimension_numbers<[1], [0], [0], [1], [0, 0, 1, 1], [], []>} : vector<16x16xf32>, vector<16x16xf32>, vector<16x16xf32> -> vector<16x16xf32>
    %cst_48 = arith.constant 2.500000e-01 : f32
    %152 = vector.broadcast %cst_48 : f32 to vector<16x16xf32>
    %153 = arith.mulf %151, %152 : vector<16x16xf32>
    %154 = arith.addf %153, %1 : vector<16x16xf32>
    %cst_49 = arith.constant dense<0xFF800000> : vector<16xf32>
    %155 = vector.multi_reduction <maximumf>, %154, %cst_49 [1] : vector<16x16xf32> to vector<16xf32>
    %156 = vector.shape_cast %155 : vector<16xf32> to vector<16x1xf32>
    %157 = vector.broadcast %156 : vector<16x1xf32> to vector<16x16xf32>
    %158 = arith.subf %154, %157 : vector<16x16xf32>
    %159 = math.exp %158 : vector<16x16xf32>
    %cst_50 = arith.constant dense<0.000000e+00> : vector<16xf32>
    %160 = vector.multi_reduction <add>, %159, %cst_50 [1] : vector<16x16xf32> to vector<16xf32>
    %161 = vector.shape_cast %160 : vector<16xf32> to vector<16x1xf32>
    %162 = vector.broadcast %161 : vector<16x1xf32> to vector<16x16xf32>
    %163 = arith.divf %159, %162 : vector<16x16xf32>
    %cst_51 = arith.constant dense<0.000000e+00> : vector<16x16xf32>
    %164 = tpu.matmul %163, %149, %cst_51 {dimension_numbers = #tpu.dot_dimension_numbers<[1], [0], [0], [1], [0, 0, 1, 1], [], []>} : vector<16x16xf32>, vector<16x16xf32>, vector<16x16xf32> -> vector<16x16xf32>
    %165 = vector.extract_strided_slice %144 {offsets = [0, 16], sizes = [16, 16], strides = [1, 1]} : vector<16x32xf32> to vector<16x16xf32>
    %166 = vector.extract_strided_slice %145 {offsets = [0, 16], sizes = [16, 16], strides = [1, 1]} : vector<16x32xf32> to vector<16x16xf32>
    %167 = vector.extract_strided_slice %146 {offsets = [0, 16], sizes = [16, 16], strides = [1, 1]} : vector<16x32xf32> to vector<16x16xf32>
    %168 = tpu.transpose %166, [1, 0] : vector<16x16xf32> -> vector<16x16xf32>
    %cst_52 = arith.constant dense<0.000000e+00> : vector<16x16xf32>
    %169 = tpu.matmul %165, %168, %cst_52 {dimension_numbers = #tpu.dot_dimension_numbers<[1], [0], [0], [1], [0, 0, 1, 1], [], []>} : vector<16x16xf32>, vector<16x16xf32>, vector<16x16xf32> -> vector<16x16xf32>
    %cst_53 = arith.constant 2.500000e-01 : f32
    %170 = vector.broadcast %cst_53 : f32 to vector<16x16xf32>
    %171 = arith.mulf %169, %170 : vector<16x16xf32>
    %172 = arith.addf %171, %1 : vector<16x16xf32>
    %cst_54 = arith.constant dense<0xFF800000> : vector<16xf32>
    %173 = vector.multi_reduction <maximumf>, %172, %cst_54 [1] : vector<16x16xf32> to vector<16xf32>
    %174 = vector.shape_cast %173 : vector<16xf32> to vector<16x1xf32>
    %175 = vector.broadcast %174 : vector<16x1xf32> to vector<16x16xf32>
    %176 = arith.subf %172, %175 : vector<16x16xf32>
    %177 = math.exp %176 : vector<16x16xf32>
    %cst_55 = arith.constant dense<0.000000e+00> : vector<16xf32>
    %178 = vector.multi_reduction <add>, %177, %cst_55 [1] : vector<16x16xf32> to vector<16xf32>
    %179 = vector.shape_cast %178 : vector<16xf32> to vector<16x1xf32>
    %180 = vector.broadcast %179 : vector<16x1xf32> to vector<16x16xf32>
    %181 = arith.divf %177, %180 : vector<16x16xf32>
    %cst_56 = arith.constant dense<0.000000e+00> : vector<16x16xf32>
    %182 = tpu.matmul %181, %167, %cst_56 {dimension_numbers = #tpu.dot_dimension_numbers<[1], [0], [0], [1], [0, 0, 1, 1], [], []>} : vector<16x16xf32>, vector<16x16xf32>, vector<16x16xf32> -> vector<16x16xf32>
    %183 = tpu.concatenate %164, %182 in 1 : vector<16x16xf32>, vector<16x16xf32> -> vector<16x32xf32>
    %cst_57 = arith.constant dense<0.000000e+00> : vector<16x32xf32>
    %184 = tpu.matmul %183, %131, %cst_57 {dimension_numbers = #tpu.dot_dimension_numbers<[1], [0], [0], [1], [0, 0, 1, 1], [], []>} : vector<16x32xf32>, vector<32x32xf32>, vector<16x32xf32> -> vector<16x32xf32>
    %185 = vector.broadcast %134 : vector<1x32xf32> to vector<16x32xf32>
    %186 = arith.addf %184, %185 : vector<16x32xf32>
    %187 = arith.addf %186, %123 : vector<16x32xf32>
    %cst_58 = arith.constant dense<0.000000e+00> : vector<16xf32>
    %188 = vector.multi_reduction <add>, %187, %cst_58 [1] : vector<16x32xf32> to vector<16xf32>
    %189 = vector.shape_cast %188 : vector<16xf32> to vector<16x1xf32>
    %cst_59 = arith.constant 3.200000e+01 : f32
    %190 = vector.broadcast %cst_59 : f32 to vector<16x1xf32>
    %191 = arith.divf %189, %190 : vector<16x1xf32>
    %192 = vector.broadcast %191 : vector<16x1xf32> to vector<16x32xf32>
    %193 = arith.subf %187, %192 : vector<16x32xf32>
    %194 = arith.mulf %193, %193 : vector<16x32xf32>
    %cst_60 = arith.constant dense<0.000000e+00> : vector<16xf32>
    %195 = vector.multi_reduction <add>, %194, %cst_60 [1] : vector<16x32xf32> to vector<16xf32>
    %196 = vector.shape_cast %195 : vector<16xf32> to vector<16x1xf32>
    %cst_61 = arith.constant 3.200000e+01 : f32
    %197 = vector.broadcast %cst_61 : f32 to vector<16x1xf32>
    %198 = arith.divf %196, %197 : vector<16x1xf32>
    %199 = vector.broadcast %191 : vector<16x1xf32> to vector<16x32xf32>
    %200 = arith.subf %187, %199 : vector<16x32xf32>
    %cst_62 = arith.constant 9.99999974E-6 : f32
    %201 = vector.broadcast %cst_62 : f32 to vector<16x1xf32>
    %202 = arith.addf %198, %201 : vector<16x1xf32>
    %203 = math.rsqrt %202 : vector<16x1xf32>
    %204 = vector.broadcast %203 : vector<16x1xf32> to vector<16x32xf32>
    %205 = arith.mulf %200, %204 : vector<16x32xf32>
    %206 = vector.broadcast %135 : vector<1x32xf32> to vector<16x32xf32>
    %207 = arith.mulf %205, %206 : vector<16x32xf32>
    %208 = vector.broadcast %136 : vector<1x32xf32> to vector<16x32xf32>
    %209 = arith.addf %207, %208 : vector<16x32xf32>
    %210 = vector.broadcast %2 : vector<16x1xf32> to vector<16x32xf32>
    %211 = arith.mulf %209, %210 : vector<16x32xf32>
    %cst_63 = arith.constant dense<0.000000e+00> : vector<16x64xf32>
    %212 = tpu.matmul %211, %132, %cst_63 {dimension_numbers = #tpu.dot_dimension_numbers<[1], [0], [0], [1], [0, 0, 1, 1], [], []>} : vector<16x32xf32>, vector<32x64xf32>, vector<16x64xf32> -> vector<16x64xf32>
    %213 = vector.broadcast %137 : vector<1x64xf32> to vector<16x64xf32>
    %214 = arith.addf %212, %213 : vector<16x64xf32>
    %cst_64 = arith.constant 0.000000e+00 : f32
    %215 = vector.broadcast %cst_64 : f32 to vector<16x64xf32>
    %216 = arith.maximumf %214, %215 : vector<16x64xf32>
    %cst_65 = arith.constant dense<0.000000e+00> : vector<16x32xf32>
    %217 = tpu.matmul %216, %127, %cst_65 {dimension_numbers = #tpu.dot_dimension_numbers<[1], [0], [0], [1], [0, 0, 1, 1], [], []>} : vector<16x64xf32>, vector<64x32xf32>, vector<16x32xf32> -> vector<16x32xf32>
    %218 = vector.broadcast %138 : vector<1x32xf32> to vector<16x32xf32>
    %219 = arith.addf %217, %218 : vector<16x32xf32>
    %220 = arith.addf %219, %211 : vector<16x32xf32>
    %cst_66 = arith.constant dense<0.000000e+00> : vector<16xf32>
    %221 = vector.multi_reduction <add>, %220, %cst_66 [1] : vector<16x32xf32> to vector<16xf32>
    %222 = vector.shape_cast %221 : vector<16xf32> to vector<16x1xf32>
    %cst_67 = arith.constant 3.200000e+01 : f32
    %223 = vector.broadcast %cst_67 : f32 to vector<16x1xf32>
    %224 = arith.divf %222, %223 : vector<16x1xf32>
    %225 = vector.broadcast %224 : vector<16x1xf32> to vector<16x32xf32>
    %226 = arith.subf %220, %225 : vector<16x32xf32>
    %227 = arith.mulf %226, %226 : vector<16x32xf32>
    %cst_68 = arith.constant dense<0.000000e+00> : vector<16xf32>
    %228 = vector.multi_reduction <add>, %227, %cst_68 [1] : vector<16x32xf32> to vector<16xf32>
    %229 = vector.shape_cast %228 : vector<16xf32> to vector<16x1xf32>
    %cst_69 = arith.constant 3.200000e+01 : f32
    %230 = vector.broadcast %cst_69 : f32 to vector<16x1xf32>
    %231 = arith.divf %229, %230 : vector<16x1xf32>
    %232 = vector.broadcast %224 : vector<16x1xf32> to vector<16x32xf32>
    %233 = arith.subf %220, %232 : vector<16x32xf32>
    %cst_70 = arith.constant 9.99999974E-6 : f32
    %234 = vector.broadcast %cst_70 : f32 to vector<16x1xf32>
    %235 = arith.addf %231, %234 : vector<16x1xf32>
    %236 = math.rsqrt %235 : vector<16x1xf32>
    %237 = vector.broadcast %236 : vector<16x1xf32> to vector<16x32xf32>
    %238 = arith.mulf %233, %237 : vector<16x32xf32>
    %239 = vector.broadcast %139 : vector<1x32xf32> to vector<16x32xf32>
    %240 = arith.mulf %238, %239 : vector<16x32xf32>
    %241 = vector.broadcast %140 : vector<1x32xf32> to vector<16x32xf32>
    %242 = arith.addf %240, %241 : vector<16x32xf32>
    %243 = vector.broadcast %2 : vector<16x1xf32> to vector<16x32xf32>
    %244 = arith.mulf %242, %243 : vector<16x32xf32>
    %c0_71 = arith.constant 0 : index
    %c0_72 = arith.constant 0 : index
    %245 = vector.load %arg7[%c0_71, %c0_72] : memref<16x32xf32, #tpu.memory_space<vmem>>, vector<16x32xf32>
    tpu.vector_store %arg7[%c0_71, %c0_72], %244 {strides = array<i32>} : memref<16x32xf32, #tpu.memory_space<vmem>>, vector<16x32xf32>,
    return
  }
  func.func @transform_0(%arg0: i32) -> (i32, i32) {
    %c0_i32 = arith.constant 0 : i32
    %c0_i32_0 = arith.constant 0 : i32
    %c0_i32_1 = arith.constant 0 : i32
    return %c0_i32, %c0_i32_0 : i32, i32
  }
  func.func @transform_1(%arg0: i32) -> (i32, i32) {
    %c0_i32 = arith.constant 0 : i32
    %c0_i32_0 = arith.constant 0 : i32
    %c0_i32_1 = arith.constant 0 : i32
    return %c0_i32, %c0_i32_0 : i32, i32
  }
  func.func @transform_2(%arg0: i32) -> (i32, i32) {
    %c0_i32 = arith.constant 0 : i32
    %c0_i32_0 = arith.constant 0 : i32
    %c0_i32_1 = arith.constant 0 : i32
    return %c0_i32, %c0_i32_0 : i32, i32
  }
  func.func @transform_3(%arg0: i32) -> (i32, i32, i32) {
    %c0_i32 = arith.constant 0 : i32
    %c0_i32_0 = arith.constant 0 : i32
    %c0_i32_1 = arith.constant 0 : i32
    %c0_i32_2 = arith.constant 0 : i32
    return %c0_i32, %c0_i32_0, %c0_i32_1 : i32, i32, i32
  }
  func.func @transform_4(%arg0: i32) -> (i32, i32, i32) {
    %c0_i32 = arith.constant 0 : i32
    %c0_i32_0 = arith.constant 0 : i32
    %c0_i32_1 = arith.constant 0 : i32
    %c0_i32_2 = arith.constant 0 : i32
    return %c0_i32, %c0_i32_0, %c0_i32_1 : i32, i32, i32
  }
  func.func @transform_5(%arg0: i32) -> (i32, i32, i32) {
    %c0_i32 = arith.constant 0 : i32
    %c0_i32_0 = arith.constant 0 : i32
    %c0_i32_1 = arith.constant 0 : i32
    %c0_i32_2 = arith.constant 0 : i32
    return %c0_i32, %c0_i32_0, %c0_i32_1 : i32, i32, i32
  }
  func.func @transform_6(%arg0: i32) -> (i32, i32) {
    %c0_i32 = arith.constant 0 : i32
    %c0_i32_0 = arith.constant 0 : i32
    %c0_i32_1 = arith.constant 0 : i32
    return %c0_i32, %c0_i32_0 : i32, i32
  }
}

</mosaic_0001>

<bundles_post_ra>
// kernel: encoder_forward.1
= control target key start
LH: loop header
LB: loop body
LE: loop exit
PB: predicated region body
PF: predicated region fallthrough
CT: control target
= control target key end

     0   :  { %vm51_vm0 = vcmask 261120   ;;  %s2824_s0 = inlined_call_operand.vmem [shape: f32[16,32], index: 0, kind: input, shape index: {}]   ;;  %s2825_s1 = inlined_call_operand.vmem [shape: f32[16,16], index: 1, kind: input, shape index: {}]   ;;  %s2826_s2 = inlined_call_operand.vmem [shape: f32[16,1], index: 2, kind: input, shape index: {}]   ;;  %s2827_s3 = inlined_call_operand.vmem [shape: f32[2,32,192], index: 3, kind: input, shape index: {}]   ;;  %s2828_s4 = inlined_call_operand.vmem [shape: f32[2,64,32], index: 4, kind: input, shape index: {}]   ;;  %s2829_s5 = inlined_call_operand.vmem [shape: f32[2,8,96], index: 5, kind: input, shape index: {}]   ;;  %s2830_s6 = inlined_call_operand.hbm [shape: f32[16,32], index: 6, kind: output, shape index: {}]  }
   0x1   :  { %v2434_v0 = vld [vmem:[%s2827_s3] sm:$0xff]  ;;  %v2439_v1 = vld [vmem:[%s2827_s3 + $0x10] sm:$0xff] }
   0x2   :  { %v2444_v2 = vld [vmem:[%s2827_s3 + $0x20] sm:$0xff]  ;;  %v2271_v3 = vpack.i.bf16 %v2439_v1, %v2434_v0  ;;  %v2120_v4 = vpack.c.bf16 %v2439_v1, %v2434_v0  ;;  %v2453_v5 = vld [vmem:[%s2827_s3 + $0x30] sm:$0xff] }
   0x3   :  { %v2458_v6 = vld [vmem:[%s2824_s0] sm:$0xff]  ;;  %v2124_v7 = vpack.c.bf16 %v2453_v5, %v2444_v2 }
   0x4   :  { %1968 = vmatprep.mubr.msk.f32.mxu1 %vm51_vm0, %v2458_v6 }
   0x5   :  { %11 = vsyncpa [#allocation3], 0  ;;  %2121 = vmatprep.subr.bf16.mxu1 %v2120_v4  ;;  %v2467_v8 = vld [vmem:[%s2824_s0 + $0x8] sm:$0xff]  ;;  %v47_v9 = vlaneseq  ;;  %v2477_v12 = vld [vmem:[%s2829_s5] sm:$0xff]  ;;  %vm139_vm1 = vcmask 130048   ;;  %s2385_s0 = smov 112  }
   0x6   :  { %2123 = vmatpush3.bf16.msra.mxu1 %v2120_v4  ;;  %s2386_s11 = smov 96   ;;  %s2387_s12 = smov 80   ;;  %vm2493_vm2 = vmpackc.low %vm139_vm1, %vm139_vm1  ;;  %v2511_v31 = vld [vmem:[%s2825_s1 + $0x8] sm:$0xff]  ;;  %v2516_v34 = vld [vmem:[%s2825_s1] sm:$0xff]  ;;  %vm795_vm3 = vcmask 523264  }
   0x7   :  { %2125 = vmatprep.subr.bf16.mxu1 %v2124_v7  ;;  %v2471_v10 = vshrl.u32 %v47_v9, 7  ;;  %s2388_s1 = smov 64   ;;  %s2389_s17 = smov 48  }
   0x8   :  { %s2390_s18 = smov 32   ;;  %s2391_s19 = smov 16  }
   0x9   :  { %v49_v11 = vsub.s32 0, %v2471_v10 }
   0xa   :  { %2127 = vmatpush3.bf16.msra.mxu1 %v2124_v7 }
   0xb   :  { %v50_v13 = vrot.slane %v2477_v12, %v49_v11 }
   0xd   :  { %1969 = vmatmul.mubr.msk.f32.vlgmr.msra.gmra.mrb[0].mxu1 %vm51_vm0, %v2467_v8 }
  0xe0   :  { %v1970_v14 = vpop.f32.mrb[0].mxu1 }
  0xe1   :  { %v130_v15 = vadd.f32 %v1970_v14, %v50_v13  ;;  %v124_v16 = vpop.f32.mrb[1].mxu1  ;;  %v2276_v14 = vpack.i.bf16 %v2453_v5, %v2444_v2 }
  0xe2   :  { %v125_v17 = vadd.f32 %v124_v16, %v50_v13 }
  0xe4   :  { %336 = vrot.lane.b32.xlu1 %v125_v17, %s2385_s0  ;;  %1975 = vmatprep.mubr.msk.f32.mxu1 %vm139_vm1, %v125_v17  ;;  %v2484_v18 = vpack.i.bf16 %v130_v15, %v125_v17 }
  0xe6   :  { %2252 = vrot.lane.b32.xlu0 %v2484_v18, %s2386_s11 }
  0xe8   :  { %338 = vrot.lane.b32.xlu1 %v130_v15, %s2385_s0 }
  0xea   :  { %2257 = vrot.lane.b32.xlu0 %v2484_v18, %s2387_s12 }
 0x156   :  { %v337_v28 = vpop.permute.xlu1 %336 }
 0x158   :  { %v2253_v19 = vpop.permute.xlu0 %2252 }
 0x159   :  { %v2255_v20 = vunpack.i.h.bf16 %v2253_v19  ;;  %v2254_v21 = vunpack.i.l.bf16 %v2253_v19 }
 0x15a   :  { %v339_v29 = vpop.permute.xlu1 %338 }
 0x15b   :  { %v2128_v23 = vpack.c.bf16 %v2255_v20, %v2254_v21 }
 0x15c   :  { %v2258_v24 = vpop.permute.xlu0 %2257 }
 0x15d   :  { %v2260_v25 = vunpack.i.h.bf16 %v2258_v24  ;;  %v2259_v26 = vunpack.i.l.bf16 %v2258_v24  ;;  %2130 = vmatprep.subr.msk.bf16.mxu1 %vm2493_vm2, %v2128_v23 }
 0x15e   :  { %2133 = vmatpush3.bf16.xpose.msk.msra.mxu1 %vm2493_vm2, %v2128_v23 }
 0x15f   :  { %v2138_v27 = vpack.c.bf16 %v2260_v25, %v2259_v26 }
 0x161   :  { %2140 = vmatprep.subr.msk.bf16.mxu1 %vm2493_vm2, %v2138_v27 }
 0x165   :  { %1976 = vmatmul.mubr.msk.f32.vlgmr.msra.gmra.mrb[2].mxu1 %vm139_vm1, %v130_v15 }
 0x166   :  { %2143 = vmatpush3.bf16.xpose.msk.msra.mxu1 %vm2493_vm2, %v2138_v27  ;;  %1989 = vmatprep.mubr.msk.f32.mxu1 %vm139_vm1, %v337_v28 }
 0x16d   :  { %1990 = vmatmul.mubr.msk.f32.vlgmr.msra.gmra.mrb[4].mxu1 %vm139_vm1, %v339_v29 }
 0x238   :  { %v1977_v30 = vpop.f32.mrb[2].mxu1 }
 0x239   :  { %v224_v32 = vmul.f32 0.25, %v1977_v30  ;;  %v214_v33 = vpop.f32.mrb[3].mxu1 }
 0x23a   :  { %v223_v35 = vmul.f32 0.25, %v214_v33 }
 0x23b   :  { %v226_v36 = vadd.f32 %v224_v32, %v2511_v31 }
 0x23c   :  { %v225_v37 = vadd.f32 %v223_v35, %v2516_v34 }
 0x23d   :  { %v230_v38 = vsel %vm139_vm1, %v226_v36, -inf }
 0x23e   :  { %231 = vmax.xlane.f32.xlu1 %v230_v38  ;;  %v227_v39 = vsel %vm139_vm1, %v225_v37, -inf }
 0x23f   :  { %228 = vmax.xlane.f32.xlu0 %v227_v39 }
 0x240   :  { %v1991_v40 = vpop.f32.mrb[4].mxu1 }
 0x241   :  { %v418_v41 = vpop.f32.mrb[5].mxu1  ;;  %v428_v42 = vmul.f32 0.25, %v1991_v40 }
 0x242   :  { %v427_v43 = vmul.f32 0.25, %v418_v41 }
 0x243   :  { %v430_v46 = vadd.f32 %v428_v42, %v2511_v31 }
 0x244   :  { %v429_v44 = vadd.f32 %v427_v43, %v2516_v34 }
 0x245   :  { %v434_v47 = vsel %vm139_vm1, %v430_v46, -inf }
 0x246   :  { %v431_v45 = vsel %vm139_vm1, %v429_v44, -inf }
 0x247   :  { %432 = vmax.xlane.f32.xlu0 %v431_v45 }
 0x24b   :  { %435 = vmax.xlane.f32.xlu0 %v434_v47 }
 0x2cb   :  { %v232_v48 = vpop.xlane.xlu1 %231 }
 0x2cc   :  { %v234_v49 = vsub.f32 %v226_v36, %v232_v48  ;;  %v229_v50 = vpop.xlane.xlu0 %228 }
 0x2cd   :  { %v233_v51 = vsub.f32 %v225_v37, %v229_v50 }
 0x2ce   :  { %v237_v52 = vmul.f32 1.442695, %v234_v49  ;;  %v552_v49 = vsub.s32 1, %v2471_v10 }
 0x2cf   :  { %v235_v53 = vmul.f32 1.442695, %v233_v51 }
 0x2d0   :  { %2313 = vpow2.f32 %v237_v52  ;;  %v553_v50 = vrot.slane %v2477_v12, %v552_v49 }
 0x2d1   :  { %2315 = vpow2.f32 %v235_v53 }
 0x2d4   :  { %v433_v54 = vpop.xlane.xlu0 %432 }
 0x2d5   :  { %v437_v55 = vsub.f32 %v429_v44, %v433_v54 }
 0x2d7   :  { %v439_v56 = vmul.f32 1.442695, %v437_v55 }
 0x2d8   :  { %v436_v57 = vpop.xlane.xlu0 %435 }
 0x2d9   :  { %2317 = vpow2.f32 %v439_v56  ;;  %v438_v58 = vsub.f32 %v430_v46, %v436_v57 }
 0x2da   :  { %v2314_v59 = vpop.eup %2313 }
 0x2db   :  { %v2316_v60 = vpop.eup %2315  ;;  %v441_v61 = vmul.f32 1.442695, %v438_v58  ;;  %v242_v62 = vsel %vm139_vm1, %v2314_v59, 0.0 }
 0x2dc   :  { %243 = vadd.xlane.f32.xlu0 %v242_v62  ;;  %v239_v63 = vsel %vm139_vm1, %v2316_v60, 0.0 }
 0x2dd   :  { %2319 = vpow2.f32 %v441_v61  ;;  %240 = vadd.xlane.f32.xlu1 %v239_v63 }
 0x2e3   :  { %v2318_v4 = vpop.eup %2317 }
 0x2e4   :  { %v443_v7 = vsel %vm139_vm1, %v2318_v4, 0.0 }
 0x2e5   :  { %444 = vadd.xlane.f32.xlu1 %v443_v7 }
 0x2e7   :  { %v2320_v9 = vpop.eup %2319 }
 0x2e8   :  { %v446_v13 = vsel %vm139_vm1, %v2320_v9, 0.0 }
 0x2e9   :  { %447 = vadd.xlane.f32.xlu0 %v446_v13 }
 0x2f6   :  { %2262 = vrot.lane.b32.xlu1 %v2484_v18, %s2388_s1 }
 0x2fa   :  { %2272 = vrot.lane.b32.xlu1 %v2271_v3, %s2390_s18 }
 0x2fe   :  { %2277 = vrot.lane.b32.xlu1 %v2276_v14, %s2390_s18 }
 0x2ff   :  { %2267 = vrot.lane.b32.xlu0 %v2484_v18, %s2389_s17 }
 0x369   :  { %v244_v16 = vpop.xlane.xlu0 %243 }
 0x36a   :  { %v241_v15 = vpop.xlane.xlu1 %240 }
 0x36b   :  { %2321 = vrcp.f32 %v241_v15  ;;  %v31_v15 = vld [vmem:[%s2827_s3 + $0x8] sm:$0xff] }
 0x36c   :  { %2323 = vrcp.f32 %v244_v16  ;;  %v33_v16 = vld [vmem:[%s2827_s3 + $0x18] sm:$0xff] }
 0x372   :  { %v445_v17 = vpop.xlane.xlu1 %444 }
 0x373   :  { %2325 = vrcp.f32 %v445_v17  ;;  %v29_v17 = vld [vmem:[%s2826_s2 + $0x8] sm:$0xff] }
 0x375   :  { %v2322_v19 = vpop.eup %2321 }
 0x376   :  { %v2263_v20 = vpop.permute.xlu1 %2262  ;;  %v448_v18 = vpop.xlane.xlu0 %447  ;;  %v246_v21 = vmul.f32 %v2322_v19, %v2316_v60  ;;  %v28_v60 = vld [vmem:[%s2826_s2] sm:$0xff]  ;;  %v2156_v19 = vpack.c.bf16 %v33_v16, %v31_v15 }
 0x377   :  { %v2265_v23 = vunpack.i.h.bf16 %v2263_v20  ;;  %v2264_v24 = vunpack.i.l.bf16 %v2263_v20  ;;  %2327 = vrcp.f32 %v448_v18  ;;  %v2324_v1 = vpop.eup %2323  ;;  %v35_v20 = vld [vmem:[%s2827_s3 + $0x28] sm:$0xff]  ;;  %v37_v18 = vld [vmem:[%s2827_s3 + $0x38] sm:$0xff] }
 0x378   :  { %1982 = vmatprep.mubr.msk.f32.mxu0 %vm139_vm1, %v246_v21  ;;  %v248_v27 = vmul.f32 %v2324_v1, %v2314_v59  ;;  %v2392_v59 = vmov 0   ;;  %2157 = vmatprep.subr.bf16.mxu1 %v2156_v19  ;;  %v2160_v21 = vpack.c.bf16 %v37_v18, %v35_v20 }
 0x379   :  { %v2134_v0 = vpack.c.bf16 %v2265_v23, %v2264_v24  ;;  %2282 = vset.pattern.permute.xlu0 %v2392_v59  ;;  %2281 = vset.pattern.permute.xlu1 %v2392_v59  ;;  %v38_v23 = vld [vmem:[%s2828_s4] sm:$0xff]  ;;  %v39_v24 = vld [vmem:[%s2828_s4 + $0x8] sm:$0xff] }
 0x37a   :  { %v2268_v2 = vpop.permute.xlu0 %2267  ;;  %v2273_v32 = vpop.permute.xlu1 %2272  ;;  %2159 = vmatpush3.bf16.msra.mxu1 %v2156_v19  ;;  %v2164_v1 = vpack.c.bf16 %v39_v24, %v38_v23 }
 0x37b   :  { %v2270_v3 = vunpack.i.h.bf16 %v2268_v2  ;;  %v2269_v5 = vunpack.i.l.bf16 %v2268_v2  ;;  %2135 = vmatprep.subr.bf16.mxu0 %v2134_v0  ;;  %v2275_v33 = vunpack.i.h.bf16 %v2273_v32  ;;  %v2274_v35 = vunpack.i.l.bf16 %v2273_v32  ;;  %2161 = vmatprep.subr.bf16.mxu1 %v2160_v21  ;;  %v41_v2 = vld [vmem:[%s2828_s4 + $0x18] sm:$0xff] }
 0x37c   :  { %2137 = vmatpush3.bf16.msra.mxu0 %v2134_v0  ;;  %v40_v0 = vld [vmem:[%s2828_s4 + $0x10] sm:$0xff] }
 0x37d   :  { %v2326_v25 = vpop.eup %2325  ;;  %v2144_v26 = vpack.c.bf16 %v2270_v3, %v2269_v5  ;;  %v2148_v36 = vpack.c.bf16 %v2275_v33, %v2274_v35  ;;  %v2168_v3 = vpack.c.bf16 %v41_v2, %v40_v0  ;;  %v42_v5 = vld [vmem:[%s2828_s4 + $0x20] sm:$0xff]  ;;  %v682_v35 = vsub.s32 2, %v2471_v10 }
 0x37e   :  { %v450_v28 = vmul.f32 %v2326_v25, %v2318_v4  ;;  %v2278_v37 = vpop.permute.xlu1 %2277  ;;  %2163 = vmatpush3.bf16.msra.mxu1 %v2160_v21  ;;  %v43_v25 = vld [vmem:[%s2828_s4 + $0x28] sm:$0xff] }
 0x37f   :  { %1983 = vmatmul.mubr.msk.f32.vlgmr.msra.gmra.mrb[0].mxu0 %vm139_vm1, %v248_v27  ;;  %2145 = vmatprep.subr.bf16.mxu0 %v2144_v26  ;;  %v2280_v38 = vunpack.i.h.bf16 %v2278_v37  ;;  %v2279_v39 = vunpack.i.l.bf16 %v2278_v37  ;;  %v683_v37 = vrot.slane %v2477_v12, %v682_v35 }
 0x380   :  { %2147 = vmatpush3.bf16.msra.mxu0 %v2144_v26  ;;  %1996 = vmatprep.mubr.msk.f32.mxu0 %vm139_vm1, %v450_v28  ;;  %v2172_v26 = vpack.c.bf16 %v43_v25, %v42_v5  ;;  %v2641_v5 = vld [vmem:[%s2827_s3 + $0x50] sm:$0xff] }
 0x381   :  { %v2328_v29 = vpop.eup %2327  ;;  %2149 = vmatprep.subr.bf16.mxu0 %v2148_v36  ;;  %v2152_v40 = vpack.c.bf16 %v2280_v38, %v2279_v39  ;;  %v688_v38 = vsub.s32 3, %v2471_v10 }
 0x382   :  { %v452_v30 = vmul.f32 %v2328_v29, %v2320_v9 }
 0x384   :  { %1997 = vmatmul.mubr.msk.f32.vlgmr.msra.gmra.mrb[2].mxu0 %vm139_vm1, %v452_v30 }
 0x385   :  { %2151 = vmatpush3.bf16.msra.mxu0 %v2148_v36 }
 0x386   :  { %2153 = vmatprep.subr.bf16.mxu0 %v2152_v40 }
 0x389   :  { %2155 = vmatpush3.bf16.msra.mxu0 %v2152_v40 }
 0x38a   :  { %2165 = vmatprep.subr.bf16.mxu0 %v2164_v1 }
 0x452   :  { %v1984_v41 = vpop.f32.mrb[0].mxu0 }
 0x453   :  { %v327_v42 = vpop.f32.mrb[1].mxu0 }
 0x457   :  { %v1998_v43 = vpop.f32.mrb[2].mxu0 }
 0x458   :  { %544 = vrot.lane.b32.xlu1 %v1998_v43, %s2391_s19  ;;  %v531_v44 = vpop.f32.mrb[3].mxu0 }
 0x459   :  { %542 = vrot.lane.b32.xlu0 %v531_v44, %s2391_s19 }
 0x4ca   :  { %v545_v45 = vpop.permute.xlu1 %544 }
 0x4cb   :  { %v543_v46 = vpop.permute.xlu0 %542  ;;  %v549_v48 = vsel %vm139_vm1, %v1984_v41, %v545_v45 }
 0x4cc   :  { %v548_v47 = vsel %vm139_vm1, %v327_v42, %v543_v46  ;;  %v689_v42 = vrot.slane %v2477_v12, %v688_v38 }
 0x4cd   :  { %2007 = vmatprep.mubr.msk.f32.mxu0 %vm51_vm0, %v548_v47 }
 0x4ce   :  { %2008 = vmatmul.mubr.msk.f32.vlgmr.msra.gmra.mrb[4].mxu0 %vm51_vm0, %v549_v48 }
 0x4cf   :  { %2167 = vmatpush3.bf16.msra.mxu0 %v2164_v1 }
 0x4d0   :  { %2169 = vmatprep.subr.bf16.mxu0 %v2168_v3 }
 0x4d3   :  { %2171 = vmatpush3.bf16.msra.mxu0 %v2168_v3  ;;  %v2636_v3 = vld [vmem:[%s2827_s3 + $0x40] sm:$0xff] }
 0x4d4   :  { %2173 = vmatprep.subr.bf16.mxu0 %v2172_v26  ;;  %v2180_v25 = vpack.c.bf16 %v2641_v5, %v2636_v3 }
 0x4d6   :  { %2181 = vmatprep.subr.bf16.mxu1 %v2180_v25 }
 0x4d7   :  { %2175 = vmatpush3.bf16.msra.mxu0 %v2172_v26  ;;  %v2648_v26 = vld [vmem:[%s2827_s3 + $0x60] sm:$0xff] }
 0x5a1   :  { %v2009_v51 = vpop.f32.mrb[4].mxu0 }
 0x5a2   :  { %v648_v52 = vadd.f32 %v2009_v51, %v553_v50  ;;  %v642_v53 = vpop.f32.mrb[5].mxu0 }
 0x5a3   :  { %v643_v54 = vadd.f32 %v642_v53, %v553_v50  ;;  %v45_v53 = vld [vmem:[%s2828_s4 + $0x38] sm:$0xff] }
 0x5a4   :  { %v652_v55 = vadd.f32 %v648_v52, %v2467_v8  ;;  %v44_v52 = vld [vmem:[%s2828_s4 + $0x30] sm:$0xff] }
 0x5a5   :  { %v651_v56 = vadd.f32 %v643_v54, %v2458_v6  ;;  %v2176_v54 = vpack.c.bf16 %v45_v53, %v44_v52 }
 0x5a6   :  { %v656_v57 = vsel %vm51_vm0, %v652_v55, 0.0 }
 0x5a7   :  { %657 = vadd.xlane.f32.xlu1 %v656_v57  ;;  %v653_v58 = vsel %vm51_vm0, %v651_v56, 0.0  ;;  %2177 = vmatprep.subr.bf16.mxu0 %v2176_v54 }
 0x5a8   :  { %654 = vadd.xlane.f32.xlu0 %v653_v58  ;;  %2179 = vmatpush3.bf16.msra.mxu0 %v2176_v54 }
 0x5b8   :  { %694 = vperm.xlu1 %2281, %v28_v60  }
 0x634   :  { %v658_v61 = vpop.xlane.xlu1 %657 }
 0x635   :  { %v661_v62 = vmul.f32 0.03125, %v658_v61  ;;  %v655_v63 = vpop.xlane.xlu0 %654 }
 0x636   :  { %v660_v8 = vmul.f32 0.03125, %v655_v63  ;;  %v793_v63 = vsub.s32 5, %v2471_v10 }
 0x637   :  { %v663_v4 = vsub.f32 %v652_v55, %v661_v62  ;;  %v706_v55 = vsub.s32 4, %v2471_v10 }
 0x638   :  { %v662_v6 = vsub.f32 %v651_v56, %v660_v8  ;;  %v2605_v46 = vpop.permute.xlu1 %694  ;;  %v794_v8 = vrot.slane %v2477_v12, %v793_v63 }
 0x639   :  { %v665_v7 = vmul.f32 %v663_v4, %v663_v4  ;;  %v707_v56 = vrot.slane %v2477_v12, %v706_v55 }
 0x63a   :  { %v664_v13 = vmul.f32 %v662_v6, %v662_v6 }
 0x63b   :  { %v669_v9 = vsel %vm51_vm0, %v665_v7, 0.0 }
 0x63c   :  { %670 = vadd.xlane.f32.xlu0 %v669_v9  ;;  %v666_v14 = vsel %vm51_vm0, %v664_v13, 0.0 }
 0x640   :  { %667 = vadd.xlane.f32.xlu0 %v666_v14 }
 0x656   :  { %699 = vperm.xlu0 %2282, %v29_v17  }
 0x6c9   :  { %v671_v27 = vpop.xlane.xlu0 %670 }
 0x6ca   :  { %v673_v28 = vmul.f32 0.03125, %v671_v27  ;;  %v2653_v27 = vld [vmem:[%s2827_s3 + $0x70] sm:$0xff] }
 0x6cc   :  { %v675_v29 = vadd.f32 1e-05, %v673_v28  ;;  %v2184_v28 = vpack.c.bf16 %v2653_v27, %v2648_v26 }
 0x6cd   :  { %v668_v30 = vpop.xlane.xlu0 %667 }
 0x6ce   :  { %2329 = vrsqrt.f32 %v675_v29  ;;  %v672_v32 = vmul.f32 0.03125, %v668_v30 }
 0x6d0   :  { %v674_v33 = vadd.f32 1e-05, %v672_v32 }
 0x6d2   :  { %2331 = vrsqrt.f32 %v674_v33 }
 0x6d5   :  { %v2607_v47 = vpop.permute.xlu0 %699 }
 0x6d8   :  { %v2330_v36 = vpop.eup %2329 }
 0x6d9   :  { %v679_v39 = vmul.f32 %v2330_v36, %v663_v4 }
 0x6db   :  { %v685_v41 = vmul.f32 %v683_v37, %v679_v39  ;;  %v907_v39 = vsub.s32 6, %v2471_v10 }
 0x6dc   :  { %v2332_v40 = vpop.eup %2331 }
 0x6dd   :  { %v678_v43 = vmul.f32 %v2332_v40, %v662_v6  ;;  %v691_v45 = vadd.f32 %v689_v42, %v685_v41  ;;  %v913_v40 = vsub.s32 7, %v2471_v10  ;;  %v908_v41 = vrot.slane %v2477_v12, %v907_v39 }
 0x6df   :  { %v684_v44 = vmul.f32 %v683_v37, %v678_v43  ;;  %v703_v51 = vmul.f32 %v2607_v47, %v691_v45 }
 0x6e1   :  { %v690_v48 = vadd.f32 %v689_v42, %v684_v44  ;;  %v914_v44 = vrot.slane %v2477_v12, %v913_v40  ;;  %v2678_v12 = vld [vmem:[%s2829_s5 + $0x8] sm:$0xff] }
 0x6e3   :  { %v702_v50 = vmul.f32 %v2605_v46, %v690_v48 }
 0x6e5   :  { %2018 = vmatprep.mubr.msk.f32.mxu1 %vm51_vm0, %v702_v50 }
 0x6e6   :  { %2019 = vmatmul.mubr.msk.f32.vlgmr.msra.gmra.mrb[6].mxu1 %vm51_vm0, %v703_v51 }
 0x6e7   :  { %2183 = vmatpush3.bf16.msra.mxu1 %v2180_v25 }
 0x6e8   :  { %2185 = vmatprep.subr.bf16.mxu1 %v2184_v28 }
 0x6eb   :  { %2187 = vmatpush3.bf16.msra.mxu1 %v2184_v28 }
 0x7b9   :  { %v2020_v57 = vpop.f32.mrb[6].mxu1 }
 0x7ba   :  { %v786_v58 = vadd.f32 %v2020_v57, %v707_v56  ;;  %v780_v59 = vpop.f32.mrb[7].mxu1  ;;  %v942_v57 = vrot.slane %v2678_v12, %v49_v11 }
 0x7bb   :  { %v781_v60 = vadd.f32 %v780_v59, %v707_v56 }
 0x7bc   :  { %v790_v62 = vmax.f32 %v786_v58, 0.0 }
 0x7bd   :  { %v789_v61 = vmax.f32 %v781_v60, 0.0 }
 0x7bf   :  { %2037 = vmatprep.mubr.msk.f32.mxu0 %vm795_vm3, %v789_v61 }
 0x7c0   :  { %2038 = vmatmul.mubr.msk.f32.vlgmr.msra.gmra.mrb[6].mxu0 %vm795_vm3, %v790_v62 }
 0x893   :  { %v2039_v4 = vpop.f32.mrb[6].mxu0 }
 0x894   :  { %v874_v6 = vadd.f32 %v2039_v4, %v794_v8  ;;  %v868_v7 = vpop.f32.mrb[7].mxu0 }
 0x895   :  { %v869_v9 = vadd.f32 %v868_v7, %v794_v8 }
 0x896   :  { %v878_v13 = vadd.f32 %v874_v6, %v703_v51 }
 0x897   :  { %v877_v14 = vadd.f32 %v869_v9, %v702_v50 }
 0x898   :  { %v882_v15 = vsel %vm51_vm0, %v878_v13, 0.0 }
 0x899   :  { %883 = vadd.xlane.f32.xlu0 %v882_v15  ;;  %v879_v16 = vsel %vm51_vm0, %v877_v14, 0.0 }
 0x89a   :  { %880 = vadd.xlane.f32.xlu1 %v879_v16 }
 0x926   :  { %v884_v17 = vpop.xlane.xlu0 %883 }
 0x927   :  { %v886_v19 = vmul.f32 0.03125, %v884_v17  ;;  %v881_v20 = vpop.xlane.xlu1 %880 }
 0x928   :  { %v885_v18 = vmul.f32 0.03125, %v881_v20 }
 0x929   :  { %v888_v21 = vsub.f32 %v878_v13, %v886_v19 }
 0x92a   :  { %v887_v23 = vsub.f32 %v877_v14, %v885_v18 }
 0x92b   :  { %v890_v1 = vmul.f32 %v888_v21, %v888_v21 }
 0x92c   :  { %v889_v24 = vmul.f32 %v887_v23, %v887_v23 }
 0x92d   :  { %v894_v2 = vsel %vm51_vm0, %v890_v1, 0.0 }
 0x92e   :  { %v891_v0 = vsel %vm51_vm0, %v889_v24, 0.0 }
 0x92f   :  { %892 = vadd.xlane.f32.xlu1 %v891_v0 }
 0x933   :  { %895 = vadd.xlane.f32.xlu1 %v894_v2 }
 0x9bc   :  { %v893_v29 = vpop.xlane.xlu1 %892 }
 0x9bd   :  { %v897_v30 = vmul.f32 0.03125, %v893_v29 }
 0x9bf   :  { %v899_v32 = vadd.f32 1e-05, %v897_v30 }
 0x9c0   :  { %v896_v33 = vpop.xlane.xlu1 %895 }
 0x9c1   :  { %2333 = vrsqrt.f32 %v899_v32  ;;  %v898_v36 = vmul.f32 0.03125, %v896_v33 }
 0x9c3   :  { %v900_v37 = vadd.f32 1e-05, %v898_v36 }
 0x9c5   :  { %2335 = vrsqrt.f32 %v900_v37 }
 0x9cb   :  { %v2334_v42 = vpop.eup %2333 }
 0x9cc   :  { %v903_v43 = vmul.f32 %v2334_v42, %v887_v23 }
 0x9ce   :  { %v909_v45 = vmul.f32 %v908_v41, %v903_v43 }
 0x9cf   :  { %v2336_v48 = vpop.eup %2335 }
 0x9d0   :  { %v904_v50 = vmul.f32 %v2336_v48, %v888_v21  ;;  %v915_v51 = vadd.f32 %v914_v44, %v909_v45 }
 0x9d2   :  { %v910_v52 = vmul.f32 %v908_v41, %v904_v50  ;;  %v2666_v53 = vmul.f32 %v915_v51, %v2605_v46 }
 0x9d4   :  { %v916_v54 = vadd.f32 %v914_v44, %v910_v52  ;;  %2048 = vmatprep.mubr.msk.f32.mxu1 %vm51_vm0, %v2666_v53 }
 0x9d6   :  { %v2671_v56 = vmul.f32 %v916_v54, %v2607_v47 }
 0x9d8   :  { %2049 = vmatmul.mubr.msk.f32.vlgmr.msra.gmra.mrb[8].mxu1 %vm51_vm0, %v2671_v56 }
 0xaab   :  { %v2050_v58 = vpop.f32.mrb[8].mxu1 }
 0xaac   :  { %v1021_v59 = vadd.f32 %v2050_v58, %v942_v57  ;;  %v1015_v60 = vpop.f32.mrb[9].mxu1 }
 0xaad   :  { %v1016_v61 = vadd.f32 %v1015_v60, %v942_v57 }
 0xaaf   :  { %2055 = vmatprep.mubr.msk.f32.mxu1 %vm139_vm1, %v1016_v61  ;;  %v2684_v62 = vpack.i.bf16 %v1021_v59, %v1016_v61 }
 0xab1   :  { %2289 = vrot.lane.b32.xlu0 %v2684_v62, %s2387_s12  ;;  %2284 = vrot.lane.b32.xlu1 %v2684_v62, %s2386_s11 }
 0xab5   :  { %1226 = vrot.lane.b32.xlu1 %v1016_v61, %s2385_s0 }
 0xab9   :  { %1228 = vrot.lane.b32.xlu1 %v1021_v59, %s2385_s0 }
 0xb23   :  { %v2290_v8 = vpop.permute.xlu0 %2289  ;;  %v2285_v11 = vpop.permute.xlu1 %2284 }
 0xb24   :  { %v2292_v4 = vunpack.i.h.bf16 %v2290_v8  ;;  %v2291_v6 = vunpack.i.l.bf16 %v2290_v8  ;;  %v2287_v7 = vunpack.i.h.bf16 %v2285_v11  ;;  %v2286_v9 = vunpack.i.l.bf16 %v2285_v11 }
 0xb25   :  { %v2303_v8 = vpack.i.bf16 %v2641_v5, %v2636_v3  ;;  %v2308_v11 = vpack.i.bf16 %v2653_v27, %v2648_v26 }
 0xb26   :  { %v2188_v13 = vpack.c.bf16 %v2287_v7, %v2286_v9  ;;  %v2198_v14 = vpack.c.bf16 %v2292_v4, %v2291_v6 }
 0xb27   :  { %v1227_v15 = vpop.permute.xlu1 %1226 }
 0xb28   :  { %2190 = vmatprep.subr.msk.bf16.mxu1 %vm2493_vm2, %v2188_v13 }
 0xb29   :  { %2193 = vmatpush3.bf16.xpose.msk.msra.mxu1 %vm2493_vm2, %v2188_v13 }
 0xb2a   :  { %2200 = vmatprep.subr.msk.bf16.mxu1 %vm2493_vm2, %v2198_v14 }
 0xb2b   :  { %v1229_v16 = vpop.permute.xlu1 %1228 }
 0xb30   :  { %2056 = vmatmul.mubr.msk.f32.vlgmr.msra.gmra.mrb[10].mxu1 %vm139_vm1, %v1021_v59 }
 0xb31   :  { %2203 = vmatpush3.bf16.xpose.msk.msra.mxu1 %vm2493_vm2, %v2198_v14  ;;  %2069 = vmatprep.mubr.msk.f32.mxu1 %vm139_vm1, %v1227_v15 }
 0xb38   :  { %2070 = vmatmul.mubr.msk.f32.vlgmr.msra.gmra.mrb[12].mxu1 %vm139_vm1, %v1229_v16 }
 0xc03   :  { %v2057_v17 = vpop.f32.mrb[10].mxu1 }
 0xc04   :  { %v1114_v19 = vmul.f32 0.25, %v2057_v17  ;;  %v1104_v20 = vpop.f32.mrb[11].mxu1 }
 0xc05   :  { %v1113_v18 = vmul.f32 0.25, %v1104_v20 }
 0xc06   :  { %v1116_v21 = vadd.f32 %v1114_v19, %v2511_v31 }
 0xc07   :  { %v1115_v23 = vadd.f32 %v1113_v18, %v2516_v34 }
 0xc08   :  { %v1120_v24 = vsel %vm139_vm1, %v1116_v21, -inf }
 0xc09   :  { %1121 = vmax.xlane.f32.xlu0 %v1120_v24  ;;  %v1117_v0 = vsel %vm139_vm1, %v1115_v23, -inf }
 0xc0a   :  { %1118 = vmax.xlane.f32.xlu1 %v1117_v0 }
 0xc0b   :  { %v2071_v22 = vpop.f32.mrb[12].mxu1 }
 0xc0c   :  { %v1308_v1 = vpop.f32.mrb[13].mxu1  ;;  %v1318_v2 = vmul.f32 0.25, %v2071_v22 }
 0xc0d   :  { %v1317_v25 = vmul.f32 0.25, %v1308_v1 }
 0xc0e   :  { %v1320_v30 = vadd.f32 %v1318_v2, %v2511_v31 }
 0xc0f   :  { %v1319_v28 = vadd.f32 %v1317_v25, %v2516_v34 }
 0xc10   :  { %v1324_v32 = vsel %vm139_vm1, %v1320_v30, -inf }
 0xc11   :  { %v1321_v29 = vsel %vm139_vm1, %v1319_v28, -inf }
 0xc12   :  { %1322 = vmax.xlane.f32.xlu1 %v1321_v29 }
 0xc16   :  { %1325 = vmax.xlane.f32.xlu1 %v1324_v32 }
 0xc96   :  { %v1122_v33 = vpop.xlane.xlu0 %1121 }
 0xc97   :  { %v1124_v36 = vsub.f32 %v1116_v21, %v1122_v33  ;;  %v1119_v37 = vpop.xlane.xlu1 %1118 }
 0xc98   :  { %v1123_v41 = vsub.f32 %v1115_v23, %v1119_v37 }
 0xc99   :  { %v1127_v42 = vmul.f32 1.442695, %v1124_v36 }
 0xc9a   :  { %v1125_v43 = vmul.f32 1.442695, %v1123_v41 }
 0xc9b   :  { %2337 = vpow2.f32 %v1127_v42 }
 0xc9c   :  { %2339 = vpow2.f32 %v1125_v43 }
 0xc9f   :  { %v1323_v44 = vpop.xlane.xlu1 %1322 }
 0xca0   :  { %v1327_v45 = vsub.f32 %v1319_v28, %v1323_v44 }
 0xca2   :  { %v1329_v48 = vmul.f32 1.442695, %v1327_v45  ;;  %v1443_v45 = vrot.slane %v2678_v12, %v552_v49 }
 0xca3   :  { %v1326_v34 = vpop.xlane.xlu1 %1325 }
 0xca4   :  { %2341 = vpow2.f32 %v1329_v48  ;;  %v1328_v50 = vsub.f32 %v1320_v30, %v1326_v34 }
 0xca5   :  { %v2338_v51 = vpop.eup %2337 }
 0xca6   :  { %v2340_v31 = vpop.eup %2339  ;;  %v1331_v52 = vmul.f32 1.442695, %v1328_v50  ;;  %v1132_v54 = vsel %vm139_vm1, %v2338_v51, 0.0 }
 0xca7   :  { %1133 = vadd.xlane.f32.xlu0 %v1132_v54  ;;  %v1129_v57 = vsel %vm139_vm1, %v2340_v31, 0.0 }
 0xca8   :  { %2343 = vpow2.f32 %v1331_v52  ;;  %1130 = vadd.xlane.f32.xlu1 %v1129_v57 }
 0xcae   :  { %v2342_v58 = vpop.eup %2341 }
 0xcaf   :  { %v1333_v59 = vsel %vm139_vm1, %v2342_v58, 0.0 }
 0xcb0   :  { %1334 = vadd.xlane.f32.xlu1 %v1333_v59 }
 0xcb2   :  { %v2344_v60 = vpop.eup %2343 }
 0xcb3   :  { %v1336_v61 = vsel %vm139_vm1, %v2344_v60, 0.0 }
 0xcb4   :  { %1337 = vadd.xlane.f32.xlu0 %v1336_v61 }
 0xcc1   :  { %2294 = vrot.lane.b32.xlu1 %v2684_v62, %s2388_s1 }
 0xcc5   :  { %2304 = vrot.lane.b32.xlu1 %v2303_v8, %s2390_s18 }
 0xcc9   :  { %2309 = vrot.lane.b32.xlu1 %v2308_v11, %s2390_s18 }
 0xcca   :  { %2299 = vrot.lane.b32.xlu0 %v2684_v62, %s2389_s17 }
 0xd34   :  { %v1134_v6 = vpop.xlane.xlu0 %1133 }
 0xd35   :  { %v1131_v4 = vpop.xlane.xlu1 %1130 }
 0xd36   :  { %2345 = vrcp.f32 %v1131_v4 }
 0xd37   :  { %2347 = vrcp.f32 %v1134_v6 }
 0xd3d   :  { %v1335_v7 = vpop.xlane.xlu1 %1334 }
 0xd3e   :  { %2349 = vrcp.f32 %v1335_v7  ;;  %v1838_v7 = vld [vmem:[%s2827_s3 + $0x58] sm:$0xff] }
 0xd40   :  { %v2346_v9 = vpop.eup %2345 }
 0xd41   :  { %v1338_v13 = vpop.xlane.xlu0 %1337  ;;  %v2295_v14 = vpop.permute.xlu1 %2294  ;;  %v1136_v62 = vmul.f32 %v2346_v9, %v2340_v31 }
 0xd42   :  { %2351 = vrcp.f32 %v1338_v13  ;;  %v2297_v15 = vunpack.i.h.bf16 %v2295_v14  ;;  %v2296_v3 = vunpack.i.l.bf16 %v2295_v14  ;;  %v2348_v16 = vpop.eup %2347  ;;  %v1840_v13 = vld [vmem:[%s2827_s3 + $0x68] sm:$0xff]  ;;  %v1842_v14 = vld [vmem:[%s2827_s3 + $0x78] sm:$0xff] }
 0xd43   :  { %2062 = vmatprep.mubr.msk.f32.mxu0 %vm139_vm1, %v1136_v62  ;;  %v1138_v20 = vmul.f32 %v2348_v16, %v2338_v51  ;;  %v2220_v62 = vpack.c.bf16 %v1842_v14, %v1840_v13 }
 0xd44   :  { %v2194_v5 = vpack.c.bf16 %v2297_v15, %v2296_v3  ;;  %v1843_v15 = vld [vmem:[%s2828_s4 + $0x40] sm:$0xff]  ;;  %v1844_v3 = vld [vmem:[%s2828_s4 + $0x48] sm:$0xff] }
 0xd45   :  { %v2300_v26 = vpop.permute.xlu0 %2299  ;;  %v2305_v0 = vpop.permute.xlu1 %2304  ;;  %v2224_v16 = vpack.c.bf16 %v1844_v3, %v1843_v15 }
 0xd46   :  { %v2302_v27 = vunpack.i.h.bf16 %v2300_v26  ;;  %v2301_v17 = vunpack.i.l.bf16 %v2300_v26  ;;  %2195 = vmatprep.subr.bf16.mxu0 %v2194_v5  ;;  %v2307_v22 = vunpack.i.h.bf16 %v2305_v0  ;;  %v2306_v1 = vunpack.i.l.bf16 %v2305_v0  ;;  %v1846_v26 = vld [vmem:[%s2828_s4 + $0x58] sm:$0xff] }
 0xd47   :  { %2197 = vmatpush3.bf16.msra.mxu0 %v2194_v5  ;;  %v1845_v5 = vld [vmem:[%s2828_s4 + $0x50] sm:$0xff] }
 0xd48   :  { %v2350_v19 = vpop.eup %2349  ;;  %v2204_v18 = vpack.c.bf16 %v2302_v27, %v2301_v17  ;;  %v2208_v2 = vpack.c.bf16 %v2307_v22, %v2306_v1  ;;  %v2228_v27 = vpack.c.bf16 %v1846_v26, %v1845_v5  ;;  %v1847_v17 = vld [vmem:[%s2828_s4 + $0x60] sm:$0xff]  ;;  %v1572_v1 = vrot.slane %v2678_v12, %v682_v35  ;;  %v1849_v35 = vld [vmem:[%s2828_s4 + $0x70] sm:$0xff] }
 0xd49   :  { %v1340_v21 = vmul.f32 %v2350_v19, %v2342_v58  ;;  %v2310_v25 = vpop.permute.xlu1 %2309  ;;  %v1848_v19 = vld [vmem:[%s2828_s4 + $0x68] sm:$0xff]  ;;  %v1786_v26 = vrot.slane %v2678_v12, %v907_v39 }
 0xd4a   :  { %2063 = vmatmul.mubr.msk.f32.vlgmr.msra.gmra.mrb[8].mxu0 %vm139_vm1, %v1138_v20  ;;  %2205 = vmatprep.subr.bf16.mxu0 %v2204_v18  ;;  %v2312_v28 = vunpack.i.h.bf16 %v2310_v25  ;;  %v2311_v29 = vunpack.i.l.bf16 %v2310_v25  ;;  %v2232_v20 = vpack.c.bf16 %v1848_v19, %v1847_v17 }
 0xd4b   :  { %2207 = vmatpush3.bf16.msra.mxu0 %v2204_v18  ;;  %2076 = vmatprep.mubr.msk.f32.mxu0 %vm139_vm1, %v1340_v21 }
 0xd4c   :  { %v2352_v23 = vpop.eup %2351  ;;  %2209 = vmatprep.subr.bf16.mxu0 %v2208_v2  ;;  %v2212_v30 = vpack.c.bf16 %v2312_v28, %v2311_v29  ;;  %v1578_v28 = vrot.slane %v2678_v12, %v688_v38  ;;  %v1850_v38 = vld [vmem:[%s2828_s4 + $0x78] sm:$0xff]  ;;  %s2393_s4 = smov [#allocation2]  }
 0xd4d   :  { %v1342_v24 = vmul.f32 %v2352_v23, %v2344_v60  ;;  %s1804_s9 = sshll.u32 %s2393_s4, 4  ;;  %s1805_s9 = int_to_ptr.vmem [resolvable:$true] %s1804_s9 }
 0xd4e   :  { %s2361_s2 = scalar_lea.vmem %s1805_s9, 256  ;;  %p2366_p1 = scmp.lt.s32.totalorder %s1805_s9, %s1805_s9 }
 0xd4f   :  { %2077 = vmatmul.mubr.msk.f32.vlgmr.msra.gmra.mrb[10].mxu0 %vm139_vm1, %v1342_v24  ;;  %p2362_p0 = scmp.ne.s32.totalorder %s1805_s9, %s2361_s2  ;;  %p2367_p2 = scmp.lt.s32.totalorder %s2361_s2, %s2361_s2 }
 0xd50   :  { %2211 = vmatpush3.bf16.msra.mxu0 %v2208_v2 }
 0xd51   :  { %2213 = vmatprep.subr.bf16.mxu0 %v2212_v30  ;;  %p2368_p3 = por %p2367_p2, %p2366_p1 }
 0xd53   :  { %p2369_p4 = pnand %p2368_p3, %p2362_p0 }
 0xd54   :  { %2215 = vmatpush3.bf16.msra.mxu0 %v2212_v30 }
 0xd55   :  { %2225 = vmatprep.subr.bf16.mxu0 %v2224_v16 }
 0xe1d   :  { %v2064_v32 = vpop.f32.mrb[8].mxu0 }
 0xe1e   :  { %v1217_v33 = vpop.f32.mrb[9].mxu0 }
 0xe22   :  { %v2078_v36 = vpop.f32.mrb[10].mxu0 }
 0xe23   :  { %1434 = vrot.lane.b32.xlu1 %v2078_v36, %s2391_s19  ;;  %v1421_v37 = vpop.f32.mrb[11].mxu0 }
 0xe24   :  { %1432 = vrot.lane.b32.xlu0 %v1421_v37, %s2391_s19 }
 0xe95   :  { %v1435_v41 = vpop.permute.xlu1 %1434 }
 0xe96   :  { %v1433_v42 = vpop.permute.xlu0 %1432  ;;  %v1439_v44 = vsel %vm139_vm1, %v2064_v32, %v1435_v41 }
 0xe97   :  { %v1438_v43 = vsel %vm139_vm1, %v1217_v33, %v1433_v42 }
 0xe98   :  { %2087 = vmatprep.mubr.msk.f32.mxu0 %vm51_vm0, %v1438_v43  ;;  %v2236_v43 = vpack.c.bf16 %v1850_v38, %v1849_v35 }
 0xe99   :  { %2088 = vmatmul.mubr.msk.f32.vlgmr.msra.gmra.mrb[12].mxu0 %vm51_vm0, %v1439_v44  ;;  %v1586_v44 = vrot.slane %v2678_v12, %v706_v55 }
 0xe9a   :  { %2227 = vmatpush3.bf16.msra.mxu0 %v2224_v16 }
 0xe9b   :  { %2229 = vmatprep.subr.bf16.mxu0 %v2228_v27 }
 0xe9e   :  { %2231 = vmatpush3.bf16.msra.mxu0 %v2228_v27 }
 0xe9f   :  { %2233 = vmatprep.subr.bf16.mxu0 %v2232_v20 }
 0xea2   :  { %2235 = vmatpush3.bf16.msra.mxu0 %v2232_v20  ;;  %v1792_v20 = vrot.slane %v2678_v12, %v913_v40 }
 0xea3   :  { %2237 = vmatprep.subr.bf16.mxu0 %v2236_v43 }
 0xea6   :  { %2239 = vmatpush3.bf16.msra.mxu0 %v2236_v43 }
 0xf6c   :  { %v2089_v48 = vpop.f32.mrb[12].mxu0 }
 0xf6d   :  { %v1538_v34 = vadd.f32 %v2089_v48, %v1443_v45  ;;  %v1532_v50 = vpop.f32.mrb[13].mxu0 }
 0xf6e   :  { %v1533_v51 = vadd.f32 %v1532_v50, %v1443_v45 }
 0xf6f   :  { %v1542_v31 = vadd.f32 %v1538_v34, %v2671_v56 }
 0xf70   :  { %v1541_v52 = vadd.f32 %v1533_v51, %v2666_v53  ;;  %v1836_v53 = vld [vmem:[%s2827_s3 + $0x48] sm:$0xff] }
 0xf71   :  { %v1546_v54 = vsel %vm51_vm0, %v1542_v31, 0.0  ;;  %v2216_v9 = vpack.c.bf16 %v1838_v7, %v1836_v53 }
 0xf72   :  { %1547 = vadd.xlane.f32.xlu1 %v1546_v54  ;;  %v1543_v57 = vsel %vm51_vm0, %v1541_v52, 0.0 }
 0xf73   :  { %1544 = vadd.xlane.f32.xlu0 %v1543_v57  ;;  %2217 = vmatprep.subr.bf16.mxu1 %v2216_v9 }
 0xf74   :  { %2219 = vmatpush3.bf16.msra.mxu1 %v2216_v9 }
 0xf75   :  { %2221 = vmatprep.subr.bf16.mxu1 %v2220_v62 }
 0xf78   :  { %2223 = vmatpush3.bf16.msra.mxu1 %v2220_v62 }
 0xfff   :  { %v1548_v58 = vpop.xlane.xlu1 %1547 }
0x1000   :  { %v1550_v59 = vmul.f32 0.03125, %v1548_v58  ;;  %v1545_v60 = vpop.xlane.xlu0 %1544 }
0x1001   :  { %v1549_v61 = vmul.f32 0.03125, %v1545_v60 }
0x1002   :  { %v1552_v8 = vsub.f32 %v1542_v31, %v1550_v59 }
0x1003   :  { %v1551_v49 = vsub.f32 %v1541_v52, %v1549_v61  ;;  %v1673_v52 = vrot.slane %v2678_v12, %v793_v63 }
0x1004   :  { %v1554_v6 = vmul.f32 %v1552_v8, %v1552_v8 }
0x1005   :  { %v1553_v11 = vmul.f32 %v1551_v49, %v1551_v49 }
0x1006   :  { %v1558_v56 = vsel %vm51_vm0, %v1554_v6, 0.0 }
0x1007   :  { %v1555_v4 = vsel %vm51_vm0, %v1553_v11, 0.0 }
0x1008   :  { %1556 = vadd.xlane.f32.xlu0 %v1555_v4 }
0x100c   :  { %1559 = vadd.xlane.f32.xlu0 %v1558_v56 }
0x1095   :  { %v1557_v18 = vpop.xlane.xlu0 %1556 }
0x1096   :  { %v1561_v21 = vmul.f32 0.03125, %v1557_v18 }
0x1098   :  { %v1563_v23 = vadd.f32 1e-05, %v1561_v21 }
0x1099   :  { %v1560_v24 = vpop.xlane.xlu0 %1559 }
0x109a   :  { %2353 = vrsqrt.f32 %v1563_v23  ;;  %v1562_v0 = vmul.f32 0.03125, %v1560_v24 }
0x109c   :  { %v1564_v22 = vadd.f32 1e-05, %v1562_v0 }
0x109e   :  { %2355 = vrsqrt.f32 %v1564_v22 }
0x10a4   :  { %v2354_v2 = vpop.eup %2353 }
0x10a5   :  { %v1567_v25 = vmul.f32 %v2354_v2, %v1551_v49 }
0x10a7   :  { %v1573_v29 = vmul.f32 %v1572_v1, %v1567_v25 }
0x10a8   :  { %v2356_v30 = vpop.eup %2355 }
0x10a9   :  { %v1568_v32 = vmul.f32 %v2356_v30, %v1552_v8  ;;  %v1579_v33 = vadd.f32 %v1578_v28, %v1573_v29 }
0x10ab   :  { %v1574_v36 = vmul.f32 %v1572_v1, %v1568_v32  ;;  %v1581_v37 = vmul.f32 %v1579_v33, %v2605_v46 }
0x10ad   :  { %v1580_v41 = vadd.f32 %v1578_v28, %v1574_v36  ;;  %2098 = vmatprep.mubr.msk.f32.mxu1 %vm51_vm0, %v1581_v37 }
0x10af   :  { %v1582_v42 = vmul.f32 %v1580_v41, %v2607_v47 }
0x10b1   :  { %2099 = vmatmul.mubr.msk.f32.vlgmr.msra.gmra.mrb[14].mxu1 %vm51_vm0, %v1582_v42 }
0x1184   :  { %v2100_v45 = vpop.f32.mrb[14].mxu1 }
0x1185   :  { %v1665_v48 = vadd.f32 %v2100_v45, %v1586_v44  ;;  %v1659_v34 = vpop.f32.mrb[15].mxu1 }
0x1186   :  { %v1660_v50 = vadd.f32 %v1659_v34, %v1586_v44 }
0x1187   :  { %v1669_v31 = vmax.f32 %v1665_v48, 0.0 }
0x1188   :  { %v1668_v51 = vmax.f32 %v1660_v50, 0.0 }
0x118a   :  { %2117 = vmatprep.mubr.msk.f32.mxu0 %vm795_vm3, %v1668_v51 }
0x118b   :  { %2118 = vmatmul.mubr.msk.f32.vlgmr.msra.gmra.mrb[14].mxu0 %vm795_vm3, %v1669_v31 }
0x125e   :  { %v2119_v54 = vpop.f32.mrb[14].mxu0 }
0x125f   :  { %v1752_v57 = vadd.f32 %v2119_v54, %v1673_v52  ;;  %v1746_v58 = vpop.f32.mrb[15].mxu0 }
0x1260   :  { %v1747_v59 = vadd.f32 %v1746_v58, %v1673_v52 }
0x1261   :  { %v1756_v60 = vadd.f32 %v1752_v57, %v1582_v42 }
0x1262   :  { %v1755_v55 = vadd.f32 %v1747_v59, %v1581_v37 }
0x1263   :  { %v1760_v61 = vsel %vm51_vm0, %v1756_v60, 0.0 }
0x1264   :  { %1761 = vadd.xlane.f32.xlu0 %v1760_v61  ;;  %v1757_v8 = vsel %vm51_vm0, %v1755_v55, 0.0 }
0x1265   :  { %1758 = vadd.xlane.f32.xlu1 %v1757_v8 }
0x12f1   :  { %v1762_v49 = vpop.xlane.xlu0 %1761 }
0x12f2   :  { %v1764_v11 = vmul.f32 0.03125, %v1762_v49  ;;  %v1759_v4 = vpop.xlane.xlu1 %1758 }
0x12f3   :  { %v1763_v6 = vmul.f32 0.03125, %v1759_v4 }
0x12f4   :  { %v1766_v56 = vsub.f32 %v1756_v60, %v1764_v11 }
0x12f5   :  { %v1765_v53 = vsub.f32 %v1755_v55, %v1763_v6 }
0x12f6   :  { %v1768_v7 = vmul.f32 %v1766_v56, %v1766_v56 }
0x12f7   :  { %v1767_v63 = vmul.f32 %v1765_v53, %v1765_v53 }
0x12f8   :  { %v1772_v9 = vsel %vm51_vm0, %v1768_v7, 0.0 }
0x12f9   :  { %1773 = vadd.xlane.f32.xlu0 %v1772_v9  ;;  %v1769_v13 = vsel %vm51_vm0, %v1767_v63, 0.0 }
0x12fa   :  { %1770 = vadd.xlane.f32.xlu1 %v1769_v13 }
0x1386   :  { %v1774_v14 = vpop.xlane.xlu0 %1773 }
0x1387   :  { %v1776_v62 = vmul.f32 0.03125, %v1774_v14  ;;  %v1771_v15 = vpop.xlane.xlu1 %1770 }
0x1388   :  { %v1775_v3 = vmul.f32 0.03125, %v1771_v15 }
0x1389   :  { %v1778_v5 = vadd.f32 1e-05, %v1776_v62 }
0x138a   :  { %v1777_v16 = vadd.f32 1e-05, %v1775_v3 }
0x138b   :  { %2357 = vrsqrt.f32 %v1778_v5 }
0x138c   :  { %2359 = vrsqrt.f32 %v1777_v16 }
0x1395   :  { %v2358_v27 = vpop.eup %2357 }
0x1396   :  { %v2360_v17 = vpop.eup %2359  ;;  %v1782_v19 = vmul.f32 %v2358_v27, %v1766_v56 }
0x1397   :  { %v1781_v18 = vmul.f32 %v2360_v17, %v1765_v53 }
0x1398   :  { %v1788_v21 = vmul.f32 %v1786_v26, %v1782_v19 }
0x1399   :  { %v1787_v23 = vmul.f32 %v1786_v26, %v1781_v18 }
0x139a   :  { %v1794_v24 = vadd.f32 %v1792_v20, %v1788_v21 }
0x139b   :  { %v1793_v0 = vadd.f32 %v1792_v20, %v1787_v23 }
0x139c   :  { %v1796_v22 = vmul.f32 %v1794_v24, %v2607_v47 }
0x139d   :  { %v1795_v1 = vmul.f32 %v1793_v0, %v2605_v46 }
0x139e   :  { %1798 = vst.msk [vmem:[#allocation2 + $0x8] sm:$0xff] %vm51_vm0, %v1796_v22 }
0x139f   :  { %1797 = vst.msk [vmem:[#allocation2] sm:$0xff] %vm51_vm0, %v1795_v1 }
0x13a0   :  { %2372 = shalt.err (!%p2369_p4)
}
0x13a1   :  { %s2373_s14 = scalar_lea.hbm %s2830_s6, 256 }
0x13a2   :  { %p2374_p5 = scmp.ne.s32.totalorder %s2830_s6, %s2373_s14  ;;  %p2377_p6 = scmp.lt.u32.totalorder %s2373_s14, %s2830_s6 }
0x13a4   :  { %p2379_p7 = pnand %p2377_p6, %p2374_p5 }
0x13a6   :  { %2382 = shalt.err (!%p2379_p7)
}
0x13a7   :  { %s2394_s1 = smov 128   ;;  %s2395_s17 = smov 8  }
0x13a8   :  { %1810 = dma.vmem_to_hbm [thread:$0]  %s1805_s9, 256, %s2830_s6, [#allocation3], %s2394_s1, %s2394_s1, %s2395_s17  }
0x13a9   :  { %2383 = dma.done.wait [#allocation3], 256  }
0x13aa   :  { %2384 = vsyncadd [#allocation3], 4294967040 }
0x13ab   :  { %1814 = vsyncpa [#allocation3], 1 }

</bundles_post_ra>
